<compile_context>
chip_gen: v6e
topology: v6e:2x2x1
jax: 0.10.0
libtpu: 0.0.40
codegen_flags: <defaults>
</compile_context>

<pallas_src>
import functools

import jax
import jax.numpy as jnp
from jax.experimental import pallas as pl
from jax.experimental.pallas import tpu as pltpu


def _round_up(n, m):
    return -(-n // m) * m


def _mun_kernel(
    x_ref, z_ref, h0_ref,          # activations: (B, IN_PAD), (B, ZP), (B, H)
    wpack_ref,                     # (IN_PAD + 6H + 8, H)   packed H-lane constants
    kkpack_ref,                    # (ZP + H, KK)           hypernet weight+bias, replicate
    slab_ref,                      # (H + KK, SLAB)         h_n placement, group-sum
    out_ref,                       # (B, SLAB)              single lane-dense slab
    *, hidden_dim, in_pad, z_pad, bn_eps,
):
    H = hidden_dim
    f32 = jnp.float32

    x = x_ref[...]
    zin = z_ref[...]
    h0 = h0_ref[...]

    # --- static sublane slices of the packed constant arrays (free) ---
    o0 = in_pad
    w1   = wpack_ref[0:o0, :]                       # pre_fc weight^T (zero-padded rows)
    w_r  = wpack_ref[o0:o0 + 2 * H, :]              # [W_ih_r^T ; W_hh_r^T]
    w_z  = wpack_ref[o0 + 2 * H:o0 + 4 * H, :]      # [W_ih_z^T ; W_hh_z^T]
    w_in = wpack_ref[o0 + 4 * H:o0 + 5 * H, :]      # W_ih_n^T
    w_hn = wpack_ref[o0 + 5 * H:o0 + 6 * H, :]      # W_hh_n^T
    vb = o0 + 6 * H
    b1    = wpack_ref[vb + 0:vb + 1, :]
    gamma = wpack_ref[vb + 1:vb + 2, :]
    beta  = wpack_ref[vb + 2:vb + 3, :]
    b_r   = wpack_ref[vb + 3:vb + 4, :]             # b_ih_r + b_hh_r (pre-summed)
    b_z   = wpack_ref[vb + 4:vb + 5, :]             # b_ih_z + b_hh_z (pre-summed)
    b_in  = wpack_ref[vb + 5:vb + 6, :]
    b_hn  = wpack_ref[vb + 6:vb + 7, :]

    # --- pre_fc: Linear(input_dim -> hidden_dim), weight pre-transposed ---
    y = jnp.dot(x, w1, preferred_element_type=f32) + b1

    # --- pre_bn (training-mode batch stats, biased var) folded into one FMA ---
    mean = jnp.mean(y, axis=0, keepdims=True)
    var = jnp.mean((y - mean) ** 2, axis=0, keepdims=True)
    scale = gamma * jax.lax.rsqrt(var + bn_eps)     # EUP rsqrt
    shift = beta - mean * scale
    # --- pre_relu ---
    a = jnp.maximum(y * scale + shift, 0.0)

    # --- GRU single step, gate order r,z,n. r/z fused across ih/hh: 4 MXU calls. ---
    ah = jnp.concatenate([a, h0], axis=1)           # (B, 2H)
    r  = jax.nn.sigmoid(jnp.dot(ah, w_r, preferred_element_type=f32) + b_r)
    zg = jax.nn.sigmoid(jnp.dot(ah, w_z, preferred_element_type=f32) + b_z)
    gi_n = jnp.dot(a, w_in, preferred_element_type=f32)
    gh_n = jnp.dot(h0, w_hn, preferred_element_type=f32)
    n = jnp.tanh(gi_n + b_in + r * (gh_n + b_hn))
    h_n = (1.0 - zg) * n + zg * h0

    # --- hypernetwork(z): bias absorbed via the ones-column appended to z ---
    whyp = kkpack_ref[0:z_pad, :]                   # (ZP, KK) = [W_hyp^T ; b_hyp ; 0]
    rep  = kkpack_ref[z_pad:, :]                    # (H, KK) lane-replicate matrix
    wflat = jnp.dot(zin, whyp, preferred_element_type=f32)      # (B, KK)

    # --- bmm(h_n.unsqueeze(1), weight.transpose(1,2)).squeeze(1), lane-dense slab:
    #   h_rep[b, o*fc_in+i] = h_n[b, i]                 (constant replicate, MXU)
    #   prod                = wflat * h_rep             (VPU)
    #   slab[b, H+o]        = sum_i prod[b, o*fc_in+i]  (offset group-sum, MXU)
    #   slab[b, 0:H]        = h_n                       (constant placement, MXU)
    h_rep = jnp.dot(h_n, rep, preferred_element_type=f32)       # (B, KK)
    hplace = slab_ref[0:H, :]                       # (H, SLAB) identity -> lanes [0, H)
    gsum = slab_ref[H:, :]                          # (KK, SLAB) -> lanes [H, H+fc_out)
    out_ref[...] = (jnp.dot(h_n, hplace, preferred_element_type=f32)
                    + jnp.dot(wflat * h_rep, gsum, preferred_element_type=f32))


def _pack_params(params):
    """One-time packing of all constants into three lane-grouped arrays."""
    w1 = jnp.asarray(params["w1"], jnp.float32)              # (H, in_dim)
    H, in_dim = int(w1.shape[0]), int(w1.shape[1])
    assert H % 8 == 0, "hidden_dim must be a multiple of 8 for sublane-aligned packing"

    wih = jnp.asarray(params["w_ih"], jnp.float32)           # (3H, H)
    whh = jnp.asarray(params["w_hh"], jnp.float32)           # (3H, H)
    b_ih = jnp.asarray(params["b_ih"], jnp.float32).reshape(3 * H)
    b_hh = jnp.asarray(params["b_hh"], jnp.float32).reshape(3 * H)
    w_hyp = jnp.asarray(params["w_hyp"], jnp.float32)        # (fc_out*fc_in, z_dim)
    b_hyp = jnp.asarray(params["b_hyp"], jnp.float32).reshape(-1)

    KK, z_dim = int(w_hyp.shape[0]), int(w_hyp.shape[1])
    assert KK % H == 0, "w_hyp rows must equal fc_output_dim * hidden_dim (fc_input_dim == hidden_dim)"
    fc_out = KK // H

    in_pad = _round_up(max(in_dim, 1), 8)
    z_pad = _round_up(z_dim + 1, 8)
    slab = max(128, _round_up(H + fc_out, 128))

    # --- wpack: pre_fc weight, fused GRU weights, bias/affine rows ---
    w1_t = jnp.zeros((in_pad, H), jnp.float32).at[:in_dim].set(w1.T)
    w_r = jnp.concatenate([wih[0:H].T, whh[0:H].T], axis=0)             # (2H, H)
    w_z = jnp.concatenate([wih[H:2 * H].T, whh[H:2 * H].T], axis=0)     # (2H, H)
    w_in = wih[2 * H:3 * H].T                                           # (H, H)
    w_hn = whh[2 * H:3 * H].T                                           # (H, H)
    vecs = jnp.zeros((8, H), jnp.float32)
    vecs = vecs.at[0].set(jnp.asarray(params["b1"], jnp.float32).reshape(H))
    vecs = vecs.at[1].set(jnp.asarray(params["gamma"], jnp.float32).reshape(H))
    vecs = vecs.at[2].set(jnp.asarray(params["beta"], jnp.float32).reshape(H))
    vecs = vecs.at[3].set(b_ih[0:H] + b_hh[0:H])
    vecs = vecs.at[4].set(b_ih[H:2 * H] + b_hh[H:2 * H])
    vecs = vecs.at[5].set(b_ih[2 * H:3 * H])
    vecs = vecs.at[6].set(b_hh[2 * H:3 * H])
    wpack = jnp.concatenate([w1_t, w_r, w_z, w_in, w_hn, vecs], axis=0)

    # --- kkpack: hypernetwork weight + bias (ones-column trick) + replicate matrix ---
    whyp_pack = jnp.zeros((z_pad, KK), jnp.float32)
    whyp_pack = whyp_pack.at[:z_dim].set(w_hyp.T)
    whyp_pack = whyp_pack.at[z_dim].set(b_hyp)
    k_idx = jnp.arange(KK)
    rep = (k_idx[None, :] % H == jnp.arange(H)[:, None]).astype(jnp.float32)   # (H, KK)
    kkpack = jnp.concatenate([whyp_pack, rep], axis=0)

    # --- slabpack: h_n placement identity + offset group-sum ---
    hplace = (jnp.arange(H)[:, None] == jnp.arange(slab)[None, :]).astype(jnp.float32)
    gsum = ((k_idx[:, None] // H + H) == jnp.arange(slab)[None, :]).astype(jnp.float32)
    slabpack = jnp.concatenate([hplace, gsum], axis=0)

    dims = dict(H=H, in_dim=in_dim, in_pad=in_pad, z_dim=z_dim, z_pad=z_pad,
                KK=KK, fc_out=fc_out, slab=slab)
    return (wpack, kkpack, slabpack), dims


def make_marginal_utility_forward(params, *, bn_eps=1e-5):
    """Packs parameters once; returns a jitted forward(x, z, h_0=None)."""
    (wpack, kkpack, slabpack), d = _pack_params(params)
    H, in_dim, in_pad = d["H"], d["in_dim"], d["in_pad"]
    z_dim, z_pad, fc_out, slab = d["z_dim"], d["z_pad"], d["fc_out"], d["slab"]

    kernel = functools.partial(_mun_kernel, hidden_dim=H, in_pad=in_pad,
                               z_pad=z_pad, bn_eps=bn_eps)
    vmem = pl.BlockSpec(memory_space=pltpu.MemorySpace.VMEM)

    @jax.jit
    def forward(x, z, h_0=None):
        x = x.astype(jnp.float32)
        z = z.astype(jnp.float32)
        B = x.shape[0]
        h0 = (jnp.zeros((B, H), jnp.float32) if h_0 is None
              else h_0[0].astype(jnp.float32))

        x2 = x[:, 0, :]                                     # squeeze(1)
        if in_pad > in_dim:
            x2 = jnp.pad(x2, ((0, 0), (0, in_pad - in_dim)))
        z_aug = jnp.concatenate([z, jnp.ones((B, 1), jnp.float32)], axis=1)
        if z_pad > z_dim + 1:
            z_aug = jnp.pad(z_aug, ((0, 0), (0, z_pad - z_dim - 1)))

        out_slab = pl.pallas_call(
            kernel,
            out_shape=jax.ShapeDtypeStruct((B, slab), jnp.float32),
            in_specs=[vmem] * 6,
            out_specs=vmem,
        )(x2, z_aug, h0, wpack, kkpack, slabpack)

        h_n = out_slab[:, :H]
        out = out_slab[:, H:H + fc_out]
        return out, h_n[None, :, :]                         # (B, fc_out), (1, B, hidden)

    return forward


def _reference_forward(params, x, z, h_0, bn_eps=1e-5):
    """Plain-JAX reference mirroring the PyTorch module (training-mode BN)."""
    hp = jax.lax.Precision.HIGHEST
    x2 = x.astype(jnp.float32)[:, 0, :]
    y = jnp.dot(x2, params["w1"].T, precision=hp) + params["b1"]
    mean = jnp.mean(y, axis=0, keepdims=True)
    var = jnp.mean((y - mean) ** 2, axis=0, keepdims=True)
    y = (y - mean) / jnp.sqrt(var + bn_eps)
    y = params["gamma"] * y + params["beta"]
    a = jnp.maximum(y, 0.0)
    H = params["w_ih"].shape[1]
    h0 = h_0[0]
    gi = jnp.dot(a, params["w_ih"].T, precision=hp) + params["b_ih"]
    gh = jnp.dot(h0, params["w_hh"].T, precision=hp) + params["b_hh"]
    r = jax.nn.sigmoid(gi[:, :H] + gh[:, :H])
    zg = jax.nn.sigmoid(gi[:, H:2 * H] + gh[:, H:2 * H])
    n = jnp.tanh(gi[:, 2 * H:] + r * gh[:, 2 * H:])
    h_n = (1.0 - zg) * n + zg * h0
    wflat = jnp.dot(z.astype(jnp.float32), params["w_hyp"].T, precision=hp) + params["b_hyp"]
    fc_out = params["w_hyp"].shape[0] // H
    w3 = wflat.reshape(x.shape[0], fc_out, H)
    out = jnp.einsum("bi,boi->bo", h_n, w3, precision=hp)
    return out, h_n[None, :, :]


def init_params(key, state_dim, action_dim, hidden_dim, fc_input_dim, fc_output_dim, z_dim):
    input_dim = state_dim + action_dim
    ks = jax.random.split(key, 8)
    scale = 0.1
    return {
        # pre_fc
        "w1": scale * jax.random.normal(ks[0], (hidden_dim, input_dim), jnp.float32),
        "b1": scale * jax.random.normal(ks[1], (1, hidden_dim), jnp.float32),
        # pre_bn affine
        "gamma": jnp.ones((1, hidden_dim), jnp.float32),
        "beta": jnp.zeros((1, hidden_dim), jnp.float32),
        # GRU (PyTorch layout: weight_ih (3H, H_in), weight_hh (3H, H))
        "w_ih": scale * jax.random.normal(ks[2], (3 * hidden_dim, hidden_dim), jnp.float32),
        "w_hh": scale * jax.random.normal(ks[3], (3 * hidden_dim, hidden_dim), jnp.float32),
        "b_ih": scale * jax.random.normal(ks[4], (1, 3 * hidden_dim), jnp.float32),
        "b_hh": scale * jax.random.normal(ks[5], (1, 3 * hidden_dim), jnp.float32),
        # hypernetwork: Linear(z_dim -> fc_output_dim * fc_input_dim)
        "w_hyp": scale * jax.random.normal(ks[6], (fc_output_dim * fc_input_dim, z_dim), jnp.float32),
        "b_hyp": scale * jax.random.normal(ks[7], (1, fc_output_dim * fc_input_dim), jnp.float32),
    }


if __name__ == "__main__":
    # Keep both the kernel and the XLA reference at true f32 matmul accuracy so
    # the 1e-5 fidelity check is meaningful (XLA's TPU default is bf16 passes).
    jax.config.update("jax_default_matmul_precision", "highest")

    # Small shapes consistent with the module's forward.
    B, state_dim, action_dim = 8, 12, 4
    hidden_dim = 32
    fc_input_dim = hidden_dim      # must equal hidden_dim for the bmm
    fc_output_dim = 8
    z_dim = 16

    key = jax.random.PRNGKey(0)
    kp, kx, kz, kh = jax.random.split(key, 4)
    params = init_params(kp, state_dim, action_dim, hidden_dim,
                         fc_input_dim, fc_output_dim, z_dim)

    x = jax.random.normal(kx, (B, 1, state_dim + action_dim), jnp.float32)
    z = jax.random.normal(kz, (B, z_dim), jnp.float32)

    forward = make_marginal_utility_forward(params)

    # h_0 = None path (module default)
    out, h_n = forward(x, z)
    out, h_n = jax.block_until_ready(out), jax.block_until_ready(h_n)
    h0_default = jnp.zeros((1, B, hidden_dim), jnp.float32)
    ref_out, ref_hn = _reference_forward(params, x, z, h0_default)
    assert out.shape == (B, fc_output_dim) and h_n.shape == (1, B, hidden_dim)
    assert jnp.allclose(out, ref_out, atol=2e-5, rtol=2e-5)
    assert jnp.allclose(h_n, ref_hn, atol=2e-5, rtol=2e-5)

    # Explicit h_0 path
    h0_test = 0.1 * jax.random.normal(kh, (1, B, hidden_dim), jnp.float32)
    out2, hn2 = forward(x, z, h0_test)
    out2, hn2 = jax.block_until_ready(out2), jax.block_until_ready(hn2)
    ref_out2, ref_hn2 = _reference_forward(params, x, z, h0_test)
    assert jnp.allclose(out2, ref_out2, atol=2e-5, rtol=2e-5)
    assert jnp.allclose(hn2, ref_hn2, atol=2e-5, rtol=2e-5)

    print("KERNEL_OK")
</pallas_src>

<mosaic_0001>
module attributes {stable_mosaic.version = 11 : i64} {
  func.func @_mun_kernel(%arg0: memref<8x16xf32, #tpu.memory_space<vmem>>, %arg1: memref<8x24xf32, #tpu.memory_space<vmem>>, %arg2: memref<8x32xf32, #tpu.memory_space<vmem>>, %arg3: memref<216x32xf32, #tpu.memory_space<vmem>>, %arg4: memref<56x256xf32, #tpu.memory_space<vmem>>, %arg5: memref<288x128xf32, #tpu.memory_space<vmem>>, %arg6: memref<8x128xf32, #tpu.memory_space<vmem>>) attributes {dimension_semantics = [], scalar_prefetch = 0 : i64, scratch_operands = 0 : i64, tpu.core_type = #tpu.core_type<tc>} {
    %c0 = arith.constant 0 : index
    %c0_0 = arith.constant 0 : index
    %0 = vector.load %arg0[%c0, %c0_0] : memref<8x16xf32, #tpu.memory_space<vmem>>, vector<8x16xf32>
    %c0_1 = arith.constant 0 : index
    %c0_2 = arith.constant 0 : index
    %1 = vector.load %arg1[%c0_1, %c0_2] : memref<8x24xf32, #tpu.memory_space<vmem>>, vector<8x24xf32>
    %c0_3 = arith.constant 0 : index
    %c0_4 = arith.constant 0 : index
    %2 = vector.load %arg2[%c0_3, %c0_4] : memref<8x32xf32, #tpu.memory_space<vmem>>, vector<8x32xf32>
    %c0_5 = arith.constant 0 : index
    %c0_6 = arith.constant 0 : index
    %3 = vector.load %arg3[%c0_5, %c0_6] : memref<216x32xf32, #tpu.memory_space<vmem>>, vector<16x32xf32>
    %c16 = arith.constant 16 : index
    %c0_7 = arith.constant 0 : index
    %4 = vector.load %arg3[%c16, %c0_7] : memref<216x32xf32, #tpu.memory_space<vmem>>, vector<64x32xf32>
    %c80 = arith.constant 80 : index
    %c0_8 = arith.constant 0 : index
    %5 = vector.load %arg3[%c80, %c0_8] : memref<216x32xf32, #tpu.memory_space<vmem>>, vector<64x32xf32>
    %c144 = arith.constant 144 : index
    %c0_9 = arith.constant 0 : index
    %6 = vector.load %arg3[%c144, %c0_9] : memref<216x32xf32, #tpu.memory_space<vmem>>, vector<32x32xf32>
    %c176 = arith.constant 176 : index
    %c0_10 = arith.constant 0 : index
    %7 = vector.load %arg3[%c176, %c0_10] : memref<216x32xf32, #tpu.memory_space<vmem>>, vector<32x32xf32>
    %c208 = arith.constant 208 : index
    %c0_11 = arith.constant 0 : index
    %8 = vector.load %arg3[%c208, %c0_11] : memref<216x32xf32, #tpu.memory_space<vmem>>, vector<1x32xf32>
    %c209 = arith.constant 209 : index
    %c0_12 = arith.constant 0 : index
    %9 = vector.load %arg3[%c209, %c0_12] : memref<216x32xf32, #tpu.memory_space<vmem>>, vector<1x32xf32>
    %c210 = arith.constant 210 : index
    %c0_13 = arith.constant 0 : index
    %10 = vector.load %arg3[%c210, %c0_13] : memref<216x32xf32, #tpu.memory_space<vmem>>, vector<1x32xf32>
    %c211 = arith.constant 211 : index
    %c0_14 = arith.constant 0 : index
    %11 = vector.load %arg3[%c211, %c0_14] : memref<216x32xf32, #tpu.memory_space<vmem>>, vector<1x32xf32>
    %c212 = arith.constant 212 : index
    %c0_15 = arith.constant 0 : index
    %12 = vector.load %arg3[%c212, %c0_15] : memref<216x32xf32, #tpu.memory_space<vmem>>, vector<1x32xf32>
    %c213 = arith.constant 213 : index
    %c0_16 = arith.constant 0 : index
    %13 = vector.load %arg3[%c213, %c0_16] : memref<216x32xf32, #tpu.memory_space<vmem>>, vector<1x32xf32>
    %c214 = arith.constant 214 : index
    %c0_17 = arith.constant 0 : index
    %14 = vector.load %arg3[%c214, %c0_17] : memref<216x32xf32, #tpu.memory_space<vmem>>, vector<1x32xf32>
    %cst = arith.constant dense<0.000000e+00> : vector<8x32xf32>
    %15 = tpu.matmul %0, %3, %cst {dimension_numbers = #tpu.dot_dimension_numbers<[1], [0], [0], [1], [0, 0, 1, 1], [], []>, precision = #tpu.contract_precision<fp32>} : vector<8x16xf32>, vector<16x32xf32>, vector<8x32xf32> -> vector<8x32xf32>
    %16 = vector.broadcast %8 : vector<1x32xf32> to vector<8x32xf32>
    %17 = arith.addf %15, %16 : vector<8x32xf32>
    %cst_18 = arith.constant dense<0.000000e+00> : vector<32xf32>
    %18 = vector.multi_reduction <add>, %17, %cst_18 [0] : vector<8x32xf32> to vector<32xf32>
    %19 = vector.shape_cast %18 : vector<32xf32> to vector<1x32xf32>
    %cst_19 = arith.constant 8.000000e+00 : f32
    %20 = vector.broadcast %cst_19 : f32 to vector<1x32xf32>
    %21 = arith.divf %19, %20 : vector<1x32xf32>
    %22 = vector.broadcast %21 : vector<1x32xf32> to vector<8x32xf32>
    %23 = arith.subf %17, %22 : vector<8x32xf32>
    %24 = arith.mulf %23, %23 : vector<8x32xf32>
    %cst_20 = arith.constant dense<0.000000e+00> : vector<32xf32>
    %25 = vector.multi_reduction <add>, %24, %cst_20 [0] : vector<8x32xf32> to vector<32xf32>
    %26 = vector.shape_cast %25 : vector<32xf32> to vector<1x32xf32>
    %cst_21 = arith.constant 8.000000e+00 : f32
    %27 = vector.broadcast %cst_21 : f32 to vector<1x32xf32>
    %28 = arith.divf %26, %27 : vector<1x32xf32>
    %cst_22 = arith.constant 9.99999974E-6 : f32
    %29 = vector.broadcast %cst_22 : f32 to vector<1x32xf32>
    %30 = arith.addf %28, %29 : vector<1x32xf32>
    %31 = math.rsqrt %30 : vector<1x32xf32>
    %32 = arith.mulf %9, %31 : vector<1x32xf32>
    %33 = arith.mulf %21, %32 : vector<1x32xf32>
    %34 = arith.subf %10, %33 : vector<1x32xf32>
    %35 = vector.broadcast %32 : vector<1x32xf32> to vector<8x32xf32>
    %36 = arith.mulf %17, %35 : vector<8x32xf32>
    %37 = vector.broadcast %34 : vector<1x32xf32> to vector<8x32xf32>
    %38 = arith.addf %36, %37 : vector<8x32xf32>
    %cst_23 = arith.constant 0.000000e+00 : f32
    %39 = vector.broadcast %cst_23 : f32 to vector<8x32xf32>
    %40 = arith.maximumf %38, %39 : vector<8x32xf32>
    %41 = tpu.concatenate %40, %2 in 1 : vector<8x32xf32>, vector<8x32xf32> -> vector<8x64xf32>
    %cst_24 = arith.constant dense<0.000000e+00> : vector<8x32xf32>
    %42 = tpu.matmul %41, %4, %cst_24 {dimension_numbers = #tpu.dot_dimension_numbers<[1], [0], [0], [1], [0, 0, 1, 1], [], []>, precision = #tpu.contract_precision<fp32>} : vector<8x64xf32>, vector<64x32xf32>, vector<8x32xf32> -> vector<8x32xf32>
    %43 = vector.broadcast %11 : vector<1x32xf32> to vector<8x32xf32>
    %44 = arith.addf %42, %43 : vector<8x32xf32>
    %45 = arith.negf %44 : vector<8x32xf32>
    %46 = math.exp %45 : vector<8x32xf32>
    %cst_25 = arith.constant 1.000000e+00 : f32
    %47 = vector.broadcast %cst_25 : f32 to vector<8x32xf32>
    %48 = arith.addf %47, %46 : vector<8x32xf32>
    %49 = arith.divf %47, %48 : vector<8x32xf32>
    %cst_26 = arith.constant dense<0.000000e+00> : vector<8x32xf32>
    %50 = tpu.matmul %41, %5, %cst_26 {dimension_numbers = #tpu.dot_dimension_numbers<[1], [0], [0], [1], [0, 0, 1, 1], [], []>, precision = #tpu.contract_precision<fp32>} : vector<8x64xf32>, vector<64x32xf32>, vector<8x32xf32> -> vector<8x32xf32>
    %51 = vector.broadcast %12 : vector<1x32xf32> to vector<8x32xf32>
    %52 = arith.addf %50, %51 : vector<8x32xf32>
    %53 = arith.negf %52 : vector<8x32xf32>
    %54 = math.exp %53 : vector<8x32xf32>
    %cst_27 = arith.constant 1.000000e+00 : f32
    %55 = vector.broadcast %cst_27 : f32 to vector<8x32xf32>
    %56 = arith.addf %55, %54 : vector<8x32xf32>
    %57 = arith.divf %55, %56 : vector<8x32xf32>
    %cst_28 = arith.constant dense<0.000000e+00> : vector<8x32xf32>
    %58 = tpu.matmul %40, %6, %cst_28 {dimension_numbers = #tpu.dot_dimension_numbers<[1], [0], [0], [1], [0, 0, 1, 1], [], []>, precision = #tpu.contract_precision<fp32>} : vector<8x32xf32>, vector<32x32xf32>, vector<8x32xf32> -> vector<8x32xf32>
    %cst_29 = arith.constant dense<0.000000e+00> : vector<8x32xf32>
    %59 = tpu.matmul %2, %7, %cst_29 {dimension_numbers = #tpu.dot_dimension_numbers<[1], [0], [0], [1], [0, 0, 1, 1], [], []>, precision = #tpu.contract_precision<fp32>} : vector<8x32xf32>, vector<32x32xf32>, vector<8x32xf32> -> vector<8x32xf32>
    %60 = vector.broadcast %13 : vector<1x32xf32> to vector<8x32xf32>
    %61 = arith.addf %58, %60 : vector<8x32xf32>
    %62 = vector.broadcast %14 : vector<1x32xf32> to vector<8x32xf32>
    %63 = arith.addf %59, %62 : vector<8x32xf32>
    %64 = arith.mulf %49, %63 : vector<8x32xf32>
    %65 = arith.addf %61, %64 : vector<8x32xf32>
    %66 = math.tanh %65 : vector<8x32xf32>
    %cst_30 = arith.constant 1.000000e+00 : f32
    %67 = vector.broadcast %cst_30 : f32 to vector<8x32xf32>
    %68 = arith.subf %67, %57 : vector<8x32xf32>
    %69 = arith.mulf %68, %66 : vector<8x32xf32>
    %70 = arith.mulf %57, %2 : vector<8x32xf32>
    %71 = arith.addf %69, %70 : vector<8x32xf32>
    %c0_31 = arith.constant 0 : index
    %c0_32 = arith.constant 0 : index
    %72 = vector.load %arg4[%c0_31, %c0_32] : memref<56x256xf32, #tpu.memory_space<vmem>>, vector<24x256xf32>
    %c24 = arith.constant 24 : index
    %c0_33 = arith.constant 0 : index
    %73 = vector.load %arg4[%c24, %c0_33] : memref<56x256xf32, #tpu.memory_space<vmem>>, vector<32x256xf32>
    %cst_34 = arith.constant dense<0.000000e+00> : vector<8x256xf32>
    %74 = tpu.matmul %1, %72, %cst_34 {dimension_numbers = #tpu.dot_dimension_numbers<[1], [0], [0], [1], [0, 0, 1, 1], [], []>, precision = #tpu.contract_precision<fp32>} : vector<8x24xf32>, vector<24x256xf32>, vector<8x256xf32> -> vector<8x256xf32>
    %cst_35 = arith.constant dense<0.000000e+00> : vector<8x256xf32>
    %75 = tpu.matmul %71, %73, %cst_35 {dimension_numbers = #tpu.dot_dimension_numbers<[1], [0], [0], [1], [0, 0, 1, 1], [], []>, precision = #tpu.contract_precision<fp32>} : vector<8x32xf32>, vector<32x256xf32>, vector<8x256xf32> -> vector<8x256xf32>
    %c0_36 = arith.constant 0 : index
    %c0_37 = arith.constant 0 : index
    %76 = vector.load %arg5[%c0_36, %c0_37] : memref<288x128xf32, #tpu.memory_space<vmem>>, vector<32x128xf32>
    %c32 = arith.constant 32 : index
    %c0_38 = arith.constant 0 : index
    %77 = vector.load %arg5[%c32, %c0_38] : memref<288x128xf32, #tpu.memory_space<vmem>>, vector<256x128xf32>
    %cst_39 = arith.constant dense<0.000000e+00> : vector<8x128xf32>
    %78 = tpu.matmul %71, %76, %cst_39 {dimension_numbers = #tpu.dot_dimension_numbers<[1], [0], [0], [1], [0, 0, 1, 1], [], []>, precision = #tpu.contract_precision<fp32>} : vector<8x32xf32>, vector<32x128xf32>, vector<8x128xf32> -> vector<8x128xf32>
    %79 = arith.mulf %74, %75 : vector<8x256xf32>
    %cst_40 = arith.constant dense<0.000000e+00> : vector<8x128xf32>
    %80 = tpu.matmul %79, %77, %cst_40 {dimension_numbers = #tpu.dot_dimension_numbers<[1], [0], [0], [1], [0, 0, 1, 1], [], []>, precision = #tpu.contract_precision<fp32>} : vector<8x256xf32>, vector<256x128xf32>, vector<8x128xf32> -> vector<8x128xf32>
    %81 = arith.addf %78, %80 : vector<8x128xf32>
    %c0_41 = arith.constant 0 : index
    %c0_42 = arith.constant 0 : index
    %82 = vector.load %arg6[%c0_41, %c0_42] : memref<8x128xf32, #tpu.memory_space<vmem>>, vector<8x128xf32>
    tpu.vector_store %arg6[%c0_41, %c0_42], %81 {strides = array<i32>} : memref<8x128xf32, #tpu.memory_space<vmem>>, vector<8x128xf32>,
    return
  }
}

</mosaic_0001>

<bundles_post_ra>
// kernel: forward.1
= control target key start
LH: loop header
LB: loop body
LE: loop exit
PB: predicated region body
PF: predicated region fallthrough
CT: control target
= control target key end

     0   :  { %11 = vsyncpa [#allocation3], 0  ;;  %s7718_s0 = inlined_call_operand.vmem [shape: f32[8,16], index: 0, kind: input, shape index: {}]   ;;  %s7719_s1 = inlined_call_operand.vmem [shape: f32[8,24], index: 1, kind: input, shape index: {}]   ;;  %s7720_s2 = inlined_call_operand.vmem [shape: f32[8,32], index: 2, kind: input, shape index: {}]   ;;  %s7721_s3 = inlined_call_operand.hbm [shape: f32[216,32], index: 3, kind: input, shape index: {}]   ;;  %s7722_s4 = inlined_call_operand.hbm [shape: f32[56,256], index: 4, kind: input, shape index: {}]   ;;  %s7723_s5 = inlined_call_operand.hbm [shape: f32[288,128], index: 5, kind: input, shape index: {}]   ;;  %s7724_s6 = inlined_call_operand.vmem [shape: f32[8,128], index: 6, kind: output, shape index: {}]  }
   0x1   :  { %12 = vsyncpa [#allocation5], 0  ;;  %s6157_s21 = smov [#allocation4]  }
   0x2   :  { %s36_s22 = sshll.u32 %s6157_s21, 4  ;;  %s37_s22 = int_to_ptr.vmem [resolvable:$true] %s36_s22 }
   0x3   :  { %s6101_s23 = scalar_lea.vmem %s37_s22, 1792  ;;  %p6106_p1 = scmp.lt.s32.totalorder %s37_s22, %s37_s22 }
   0x4   :  { %p6102_p0 = scmp.ne.s32.totalorder %s37_s22, %s6101_s23  ;;  %p6107_p2 = scmp.lt.s32.totalorder %s6101_s23, %s6101_s23 }
   0x6   :  { %p6108_p3 = por %p6107_p2, %p6106_p1 }
   0x8   :  { %p6109_p4 = pnand %p6108_p3, %p6102_p0 }
   0xa   :  { %6112 = shalt.err (!%p6109_p4)
}
   0xb   :  { %s6158_s24 = smov 256   ;;  %s6159_s25 = smov 16  }
   0xc   :  { %42 = dma.hbm_to_vmem [thread:$0]  %s7722_s4, 1792, %s37_s22, [#allocation5], %s6158_s24, %s6158_s24, %s6159_s25  }
   0xd   :  { %s6160_s28 = smov [#allocation2]  }
   0xe   :  { %s24_s29 = sshll.u32 %s6160_s28, 4  ;;  %s25_s29 = int_to_ptr.vmem [resolvable:$true] %s24_s29 }
   0xf   :  { %s6121_s30 = scalar_lea.vmem %s25_s29, 3456  ;;  %p6126_p6 = scmp.lt.s32.totalorder %s25_s29, %s25_s29 }
  0x10   :  { %p6122_p5 = scmp.ne.s32.totalorder %s25_s29, %s6121_s30  ;;  %p6127_p7 = scmp.lt.s32.totalorder %s6121_s30, %s6121_s30 }
  0x12   :  { %p6128_p8 = por %p6127_p7, %p6126_p6 }
  0x14   :  { %p6129_p9 = pnand %p6128_p8, %p6122_p5 }
  0x16   :  { %6132 = shalt.err (!%p6129_p9)
}
  0x17   :  { %s6161_s7 = smov 128   ;;  %s6162_s8 = smov 8  }
  0x18   :  { %30 = dma.hbm_to_vmem [thread:$0]  %s7721_s3, 3456, %s25_s29, [#allocation3], %s6161_s7, %s6161_s7, %s6162_s8  }
  0x19   :  { %s6163_s11 = smov [#allocation6]  }
  0x1a   :  { %s48_s12 = sshll.u32 %s6163_s11, 4  ;;  %s49_s12 = int_to_ptr.vmem [resolvable:$true] %s48_s12 }
  0x1b   :  { %s6141_s4 = scalar_lea.vmem %s49_s12, 4608  ;;  %p6146_p11 = scmp.lt.s32.totalorder %s49_s12, %s49_s12 }
  0x1c   :  { %p6142_p10 = scmp.ne.s32.totalorder %s49_s12, %s6141_s4  ;;  %p6147_p12 = scmp.lt.s32.totalorder %s6141_s4, %s6141_s4 }
  0x1e   :  { %p6148_p13 = por %p6147_p12, %p6146_p11 }
  0x20   :  { %p6149_p0 = pnand %p6148_p13, %p6142_p10 }
  0x22   :  { %6152 = shalt.err (!%p6149_p0)
}
  0x23   :  { %54 = dma.hbm_to_vmem [thread:$0]  %s7723_s5, 4608, %s49_s12, [#allocation5], %s6161_s7, %s6161_s7, %s6162_s8  }
  0x24   :  { %6153 = dma.done.wait [#allocation3], 3456  }
  0x25   :  { %6154 = vsyncadd [#allocation3], 4294963840 }
  0x26   :  { %6155 = dma.done.wait [#allocation5], 6400  }
  0x27   :  { %6156 = vsyncadd [#allocation5], 4294960896  ;;  %v7725_v0 = vmov 0.0   ;;  %vm6165_vm0 = vmmov 0   ;;  %vm104_vm1 = vcmask 130048   ;;  %v68_v1 = vld [vmem:[#allocation2 + $0x8] sm:$0xff] }
  0x28   :  { %5602 = vmatprep.subr.mxu0 %v7725_v0  ;;  %5609 = vmatprep.subr.mxu1 %v7725_v0  ;;  %v67_v2 = vld [vmem:[#allocation2] sm:$0xff]  ;;  %v137_v4 = vand.u32 4294901760, %v68_v1  ;;  %s6166_s17 = smov 32   ;;  %v76_v21 = vld [vmem:[#allocation2 + $0x48] sm:$0xff]  ;;  %v74_v26 = vld [vmem:[#allocation2 + $0x38] sm:$0xff]  ;;  %vm567_vm2 = vcmask 261120  }
  0x29   :  { %5606 = vmatprep.mubr.msk.f32.mxu0 %vm6165_vm0, %v7725_v0  ;;  %5613 = vmatprep.mubr.msk.f32.mxu1 %vm6165_vm0, %v7725_v0  ;;  %v64_v3 = vld [vmem:[%s7718_s0] sm:$0xff]  ;;  %v140_v5 = vand.u32 4294901760, %v67_v2  ;;  %v6250_v22 = vand.u32 4294901760, %v76_v21  ;;  %v6263_v29 = vand.u32 4294901760, %v74_v26  ;;  %v73_v30 = vld [vmem:[#allocation2 + $0x30] sm:$0xff]  ;;  %v72_v35 = vld [vmem:[#allocation2 + $0x28] sm:$0xff] }
  0x2a   :  { %v106_v6 = vsel %vm104_vm1, %v64_v3, 0  ;;  %v6223_v7 = vld [vmem:[%s7720_s2] sm:$0xff]  ;;  %5603 = vmatpush3.msra.mxu0 %v137_v4  ;;  %v215_v9 = vsub.f32 %v68_v1, %v137_v4  ;;  %v6275_v34 = vand.u32 4294901760, %v73_v30  ;;  %v6285_v40 = vand.u32 4294901760, %v72_v35  ;;  %v70_v47 = vld [vmem:[#allocation2 + $0x18] sm:$0xff]  ;;  %v69_v53 = vld [vmem:[#allocation2 + $0x10] sm:$0xff] }
  0x2b   :  { %v175_v8 = vand.u32 4294901760, %v106_v6  ;;  %604 = vrot.lane.b32.xlu0 %v6223_v7, %s6166_s17  ;;  %v222_v10 = vsub.f32 %v67_v2, %v140_v5  ;;  %5604 = vmatprep.subr.mxu0 %v7725_v0  ;;  %v75_v23 = vld [vmem:[#allocation2 + $0x40] sm:$0xff]  ;;  %v6253_v24 = vsub.f32 %v76_v21, %v6250_v22  ;;  %v6272_v33 = vsub.f32 %v74_v26, %v6263_v29 }
  0x2c   :  { %5605 = vmatpush3.msra.mxu0 %v140_v5  ;;  %v216_v12 = vand.u32 4294901760, %v215_v9  ;;  %v6255_v25 = vand.u32 4294901760, %v75_v23  ;;  %v6283_v39 = vsub.f32 %v73_v30, %v6275_v34  ;;  %v71_v41 = vld [vmem:[#allocation2 + $0x20] sm:$0xff]  ;;  %v6297_v46 = vsub.f32 %v72_v35, %v6285_v40 }
  0x2d   :  { %v176_v11 = vsub.f32 %v106_v6, %v175_v8  ;;  %v223_v13 = vand.u32 4294901760, %v222_v10  ;;  %5616 = vmatprep.subr.mxu0 %v7725_v0  ;;  %v718_v27 = vand.u32 4294901760, %v6253_v24  ;;  %v732_v38 = vand.u32 4294901760, %v6272_v33  ;;  %v5169_v6 = vld [vmem:[#allocation2 + $0xd0] ss:$0 sm:$0xff] }
  0x2e   :  { %v217_v15 = vsub.f32 %v215_v9, %v216_v12  ;;  %v6261_v28 = vsub.f32 %v75_v23, %v6255_v25  ;;  %v6291_v44 = vand.u32 4294901760, %v71_v41  ;;  %v739_v45 = vand.u32 4294901760, %v6283_v39 }
  0x2f   :  { %v177_v14 = vand.u32 4294901760, %v176_v11  ;;  %v224_v16 = vsub.f32 %v222_v10, %v223_v13  ;;  %v719_v31 = vsub.f32 %v6253_v24, %v718_v27  ;;  %v733_v43 = vsub.f32 %v6272_v33, %v732_v38 }
  0x30   :  { %v218_v18 = vand.u32 4294901760, %v217_v15  ;;  %v725_v32 = vand.u32 4294901760, %v6261_v28  ;;  %v6301_v49 = vsub.f32 %v71_v41, %v6291_v44  ;;  %v6303_v50 = vand.u32 4294901760, %v70_v47 }
  0x31   :  { %v178_v17 = vsub.f32 %v176_v11, %v177_v14  ;;  %v225_v19 = vand.u32 4294901760, %v224_v16  ;;  %v720_v36 = vand.u32 4294901760, %v719_v31  ;;  %v734_v48 = vand.u32 4294901760, %v733_v43 }
  0x32   :  { %5610 = vmatpush3.msra.mxu1 %v218_v18  ;;  %v726_v37 = vsub.f32 %v6261_v28, %v725_v32  ;;  %v740_v51 = vsub.f32 %v6283_v39, %v739_v45  ;;  %v746_v52 = vand.u32 4294901760, %v6297_v46  ;;  %v753_v54 = vand.u32 4294901760, %v6301_v49 }
  0x33   :  { %v179_v20 = vand.u32 4294901760, %v178_v17  ;;  %5611 = vmatprep.subr.mxu1 %v7725_v0  ;;  %v6314_v55 = vsub.f32 %v70_v47, %v6303_v50  ;;  %v6316_v56 = vand.u32 4294901760, %v69_v53  ;;  %vm612_vm3 = vcmask 523264  }
  0x34   :  { %5612 = vmatpush3.msra.mxu1 %v225_v19  ;;  %v727_v42 = vand.u32 4294901760, %v726_v37  ;;  %v741_v57 = vand.u32 4294901760, %v740_v51  ;;  %v747_v58 = vsub.f32 %v6297_v46, %v746_v52  ;;  %v754_v59 = vsub.f32 %v6301_v49, %v753_v54 }
  0x35   :  { %5607 = vmatmul.mubr.f32.vlgmr.msra.gmra.mxu0 %v179_v20  ;;  %5614 = vmatmul.mubr.f32.vlgmr.msra.gmra.mxu1 %v175_v8  ;;  %v760_v60 = vand.u32 4294901760, %v6314_v55  ;;  %v6329_v61 = vsub.f32 %v69_v53, %v6316_v56  ;;  %vm2710_vm4 = vcmask 195584  }
  0x36   :  { %5617 = vmatpush3.msra.mxu0 %v215_v9  ;;  %5623 = vmatprep.subr.mxu1 %v7725_v0  ;;  %v748_v62 = vand.u32 4294901760, %v747_v58  ;;  %v755_v63 = vand.u32 4294901760, %v754_v59 }
  0x37   :  { %5618 = vmatprep.subr.mxu0 %v7725_v0  ;;  %5620 = vmatprep.mubr.msk.f32.mxu0 %vm6165_vm0, %v7725_v0  ;;  %v761_v1 = vsub.f32 %v6314_v55, %v760_v60  ;;  %v767_v2 = vand.u32 4294901760, %v6329_v61 }
  0x38   :  { %5619 = vmatpush3.msra.mxu0 %v222_v10  ;;  %5624 = vmatpush3.msra.mxu1 %v137_v4 }
  0x39   :  { %5621 = vmatmul.mubr.f32.vlgmr.msra.gmra.mxu0 %v176_v11  ;;  %5625 = vmatprep.subr.mxu1 %v7725_v0  ;;  %v762_v3 = vand.u32 4294901760, %v761_v1 }
  0x3a   :  { %5630 = vmatprep.subr.mxu0 %v7725_v0  ;;  %5626 = vmatpush3.msra.mxu1 %v140_v5 }
  0x3b   :  { %5627 = vmatprep.mubr.msk.f32.mxu1 %vm6165_vm0, %v7725_v0  ;;  %5631 = vmatpush3.msra.mxu0 %v216_v12 }
  0x3c   :  { %5628 = vmatmul.mubr.f32.vlgmr.msra.gmra.mxu1 %v177_v14  ;;  %5632 = vmatprep.subr.mxu0 %v7725_v0 }
  0x3d   :  { %5637 = vmatprep.subr.mxu1 %v7725_v0  ;;  %5633 = vmatpush3.msra.mxu0 %v223_v13 }
  0x3e   :  { %5634 = vmatprep.mubr.msk.f32.mxu0 %vm6165_vm0, %v7725_v0  ;;  %5638 = vmatpush3.msra.mxu1 %v137_v4  ;;  %v768_v4 = vsub.f32 %v6329_v61, %v767_v2 }
  0x3f   :  { %5635 = vmatmul.mubr.f32.vlgmr.msra.gmra.mxu0 %v175_v8  ;;  %5639 = vmatprep.subr.mxu1 %v7725_v0 }
  0x40   :  { %5640 = vmatpush3.msra.mxu1 %v140_v5  ;;  %5641 = vmatprep.mubr.msk.f32.mxu1 %vm6165_vm0, %v7725_v0  ;;  %v769_v5 = vand.u32 4294901760, %v768_v4 }
  0x41   :  { %5642 = vmatmul.mubr.f32.vlgmr.msra.gmra.mxu1 %v175_v8  ;;  %5663 = vmatprep.subr.mxu1 %v7725_v0 }
  0x42   :  { %5644 = vmatprep.subr.mxu0 %v7725_v0  ;;  %5679 = vmatprep.mubr.msk.f32.mxu1 %vm6165_vm0, %v7725_v0 }
  0x43   :  { %5660 = vmatprep.mubr.msk.f32.mxu0 %vm6165_vm0, %v7725_v0  ;;  %5645 = vmatpush3.msra.mxu0 %v6250_v22 }
  0x44   :  { %5646 = vmatprep.subr.mxu0 %v7725_v0  ;;  %5664 = vmatpush3.msra.mxu1 %v720_v36 }
  0x45   :  { %5647 = vmatpush3.msra.mxu0 %v6255_v25  ;;  %5665 = vmatprep.subr.mxu1 %v7725_v0 }
  0x46   :  { %5648 = vmatprep.subr.mxu0 %v7725_v0  ;;  %5666 = vmatpush3.msra.mxu1 %v727_v42 }
  0x47   :  { %5649 = vmatpush3.msra.mxu0 %v6263_v29  ;;  %5667 = vmatprep.subr.mxu1 %v7725_v0 }
  0x48   :  { %5650 = vmatprep.subr.mxu0 %v7725_v0  ;;  %5668 = vmatpush3.msra.mxu1 %v734_v48 }
  0x49   :  { %5651 = vmatpush3.msra.mxu0 %v6275_v34  ;;  %5669 = vmatprep.subr.mxu1 %v7725_v0 }
  0x4a   :  { %5652 = vmatprep.subr.mxu0 %v7725_v0  ;;  %5670 = vmatpush3.msra.mxu1 %v741_v57 }
  0x4b   :  { %5653 = vmatpush3.msra.mxu0 %v6285_v40  ;;  %5671 = vmatprep.subr.mxu1 %v7725_v0 }
  0x4c   :  { %5654 = vmatprep.subr.mxu0 %v7725_v0  ;;  %5672 = vmatpush3.msra.mxu1 %v748_v62 }
  0x4d   :  { %5655 = vmatpush3.msra.mxu0 %v6291_v44  ;;  %5673 = vmatprep.subr.mxu1 %v7725_v0 }
  0x4e   :  { %5656 = vmatprep.subr.mxu0 %v7725_v0  ;;  %5674 = vmatpush3.msra.mxu1 %v755_v63 }
  0x4f   :  { %5657 = vmatpush3.msra.mxu0 %v6303_v50  ;;  %5675 = vmatprep.subr.mxu1 %v7725_v0 }
  0x50   :  { %5658 = vmatprep.subr.mxu0 %v7725_v0  ;;  %5676 = vmatpush3.msra.mxu1 %v762_v3 }
  0x51   :  { %5659 = vmatpush3.msra.mxu0 %v6316_v56  ;;  %5677 = vmatprep.subr.mxu1 %v7725_v0 }
  0x52   :  { %5682 = vmatprep.subr.mxu0 %v7725_v0  ;;  %5678 = vmatpush3.msra.mxu1 %v769_v5 }
  0x53   :  { %5701 = vmatprep.subr.mxu1 %v7725_v0 }
  0xf5   :  { %v181_v8 = vpop.f32.mrf.mxu0  ;;  %v262_v11 = vpop.f32.mrf.mxu1 }
  0xf6   :  { %v182_v9 = vadd.f32 %v5169_v6, %v181_v8  ;;  %v592_v6 = vlaneseq }
  0xf7   :  { %v5608_v10 = vpop.f32.mrf.mxu0  ;;  %v5615_v13 = vpop.f32.mrf.mxu1 }
  0xf8   :  { %v263_v12 = vadd.f32 %v262_v11, %v182_v9  ;;  %v593_v8 = vshrl.u32 %v592_v6, 7  ;;  %v94_v9 = vld [vmem:[#allocation2 + $0xd1] sm:$0x1]  ;;  %v95_v13 = vld [vmem:[#allocation2 + $0xd2] sm:$0x1] }
  0xf9   :  { %v338_v14 = vpop.f32.mrf.mxu0 }
  0xfa   :  { %v339_v15 = vadd.f32 %v338_v14, %v263_v12  ;;  %v594_v10 = vsub.s32 0, %v593_v8 }
  0xfb   :  { %v5622_v16 = vpop.f32.mrf.mxu0 }
  0xfc   :  { %v413_v17 = vpop.f32.mrf.mxu1 }
  0xfd   :  { %v414_v18 = vadd.f32 %v413_v17, %v339_v15 }
  0xfe   :  { %v5629_v19 = vpop.f32.mrf.mxu1 }
  0xff   :  { %v490_v20 = vpop.f32.mrf.mxu0 }
 0x100   :  { %v491_v21 = vadd.f32 %v490_v20, %v414_v18  ;;  %v605_v20 = vpop.permute.xlu0 %604 }
 0x101   :  { %v5636_v23 = vpop.f32.mrf.mxu0  ;;  %v563_v26 = vpop.f32.mrf.mxu1 }
 0x102   :  { %v564_v30 = vadd.f32 %v563_v26, %v491_v21 }
 0x103   :  { %v5643_v31 = vpop.f32.mrf.mxu1 }
 0x104   :  { %v568_v35 = vsel %vm567_vm2, %v564_v30, 0.0 }
 0x105   :  { %v569_v36 = vrot.slane %v568_v35, 4 }
 0x107   :  { %v570_v37 = vadd.f32 %v569_v36, %v568_v35 }
 0x109   :  { %v571_v41 = vrot.slane %v570_v37, 2 }
 0x10b   :  { %v572_v42 = vadd.f32 %v571_v41, %v570_v37  ;;  %v84_v41 = vld [vmem:[#allocation2 + $0x88] sm:$0xff] }
 0x10d   :  { %v573_v43 = vrot.slane %v572_v42, 1 }
 0x10f   :  { %v574_v47 = vadd.f32 %v573_v43, %v572_v42  ;;  %v83_v42 = vld [vmem:[#allocation2 + $0x80] sm:$0xff]  ;;  %v6394_v43 = vand.u32 4294901760, %v84_v41 }
 0x111   :  { %v576_v48 = vmul.f32 0.125, %v574_v47  ;;  %v82_v47 = vld [vmem:[#allocation2 + $0x78] sm:$0xff] }
 0x113   :  { %v577_v51 = vsub.f32 %v564_v30, %v576_v48 }
 0x115   :  { %v578_v53 = vmul.f32 %v577_v51, %v577_v51  ;;  %v81_v51 = vld [vmem:[#allocation2 + $0x70] sm:$0xff] }
 0x117   :  { %v579_v57 = vsel %vm567_vm2, %v578_v53, 0.0  ;;  %v6407_v53 = vsub.f32 %v84_v41, %v6394_v43 }
 0x118   :  { %v580_v58 = vrot.slane %v579_v57, 4 }
 0x11a   :  { %v581_v59 = vadd.f32 %v580_v58, %v579_v57  ;;  %v6409_v57 = vand.u32 4294901760, %v82_v47  ;;  %v6418_v58 = vand.u32 4294901760, %v81_v51 }
 0x11c   :  { %v582_v62 = vrot.slane %v581_v59, 2 }
 0x11e   :  { %v583_v63 = vadd.f32 %v582_v62, %v581_v59  ;;  %v1265_v59 = vand.u32 4294901760, %v6407_v53  ;;  %v79_v62 = vld [vmem:[#allocation2 + $0x60] sm:$0xff] }
 0x120   :  { %v584_v1 = vrot.slane %v583_v63, 1 }
 0x122   :  { %v585_v3 = vadd.f32 %v584_v1, %v583_v63 }
 0x124   :  { %v586_v4 = vmul.f32 0.125, %v585_v3  ;;  %v78_v3 = vld [vmem:[#allocation2 + $0x58] sm:$0xff] }
 0x125   :  { %v6456_v6 = vand.u32 4294901760, %v78_v3 }
 0x126   :  { %v587_v5 = vadd.f32 1e-05, %v586_v4  ;;  %v6442_v4 = vand.u32 4294901760, %v79_v62 }
 0x128   :  { %6080 = vrsqrt.f32 %v587_v5  ;;  %v77_v5 = vld [vmem:[#allocation2 + $0x50] sm:$0xff] }
 0x129   :  { %v6470_v8 = vand.u32 4294901760, %v77_v5 }
 0x135   :  { %v6081_v11 = vpop.eup %6080 }
 0x136   :  { %v589_v12 = vmul.f32 %v6081_v11, %v94_v9  ;;  %v6483_v9 = vsub.f32 %v78_v3, %v6456_v6 }
 0x138   :  { %v590_v14 = vmul.f32 %v589_v12, %v576_v48  ;;  %v595_v15 = vrot.slane %v589_v12, %v594_v10  ;;  %v6400_v48 = vand.u32 4294901760, %v83_v42 }
 0x13a   :  { %v591_v16 = vsub.f32 %v95_v13, %v590_v14  ;;  %v596_v17 = vmul.f32 %v595_v15, %v564_v30  ;;  %v88_v15 = vld [vmem:[#allocation2 + $0xa8] sm:$0xff] }
 0x13c   :  { %v600_v18 = vrot.slane %v591_v16, %v594_v10  ;;  %v6495_v10 = vsub.f32 %v77_v5, %v6470_v8  ;;  %v87_v16 = vld [vmem:[#allocation2 + $0xa0] sm:$0xff] }
 0x13e   :  { %v6348_v19 = vadd.f32 %v600_v18, %v596_v17  ;;  %v6580_v17 = vand.u32 4294901760, %v88_v15  ;;  %v86_v18 = vld [vmem:[#allocation2 + $0x98] sm:$0xff] }
 0x140   :  { %v602_v21 = vmax.f32 %v6348_v19, 0.0 }
 0x142   :  { %v607_v23 = vsel %vm567_vm2, %v602_v21, %v605_v20  ;;  %v6586_v20 = vand.u32 4294901760, %v87_v16 }
 0x143   :  { %v614_v26 = vsel %vm612_vm3, %v607_v23, 0  ;;  %v85_v23 = vld [vmem:[#allocation2 + $0x90] sm:$0xff] }
 0x144   :  { %v6354_v31 = vand.u32 4294901760, %v614_v26 }
 0x146   :  { %v6357_v35 = vsub.f32 %v614_v26, %v6354_v31  ;;  %5680 = vmatmul.mubr.f32.vlgmr.msra.gmra.mxu1 %v6354_v31  ;;  %v6593_v26 = vsub.f32 %v88_v15, %v6580_v17 }
 0x147   :  { %5702 = vmatpush3.msra.mxu1 %v6250_v22  ;;  %5717 = vmatprep.mubr.msk.f32.mxu1 %vm6165_vm0, %v7725_v0 }
 0x148   :  { %v6364_v30 = vand.u32 4294901760, %v6357_v35  ;;  %5703 = vmatprep.subr.mxu1 %v7725_v0  ;;  %v1819_v41 = vand.u32 4294901760, %v6593_v26 }
 0x149   :  { %5704 = vmatpush3.msra.mxu1 %v6255_v25 }
 0x14a   :  { %5705 = vmatprep.subr.mxu1 %v7725_v0  ;;  %v692_v36 = vsub.f32 %v6357_v35, %v6364_v30 }
 0x14b   :  { %5706 = vmatpush3.msra.mxu1 %v6263_v29 }
 0x14c   :  { %5707 = vmatprep.subr.mxu1 %v7725_v0  ;;  %v6373_v37 = vand.u32 4294901760, %v692_v36  ;;  %v6602_v36 = vsub.f32 %v87_v16, %v6586_v20 }
 0x14d   :  { %5708 = vmatpush3.msra.mxu1 %v6275_v34 }
 0x14e   :  { %5709 = vmatprep.subr.mxu1 %v7725_v0  ;;  %5661 = vmatmul.mubr.f32.vlgmr.msra.gmra.mxu0 %v6373_v37 }
 0x14f   :  { %5683 = vmatpush3.msra.mxu0 %v6253_v24  ;;  %5710 = vmatpush3.msra.mxu1 %v6285_v40  ;;  %v1266_v24 = vsub.f32 %v6407_v53, %v1265_v59 }
 0x150   :  { %5684 = vmatprep.subr.mxu0 %v7725_v0  ;;  %5711 = vmatprep.subr.mxu1 %v7725_v0 }
 0x151   :  { %5685 = vmatpush3.msra.mxu0 %v6261_v28  ;;  %5712 = vmatpush3.msra.mxu1 %v6291_v44 }
 0x152   :  { %5686 = vmatprep.subr.mxu0 %v7725_v0  ;;  %5713 = vmatprep.subr.mxu1 %v7725_v0 }
 0x153   :  { %5687 = vmatpush3.msra.mxu0 %v6272_v33  ;;  %5714 = vmatpush3.msra.mxu1 %v6303_v50  ;;  %v1267_v33 = vand.u32 4294901760, %v1266_v24 }
 0x154   :  { %5688 = vmatprep.subr.mxu0 %v7725_v0  ;;  %5715 = vmatprep.subr.mxu1 %v7725_v0 }
 0x155   :  { %5689 = vmatpush3.msra.mxu0 %v6283_v39  ;;  %5716 = vmatpush3.msra.mxu1 %v6316_v56 }
 0x156   :  { %5690 = vmatprep.subr.mxu0 %v7725_v0  ;;  %5718 = vmatmul.mubr.f32.vlgmr.msra.gmra.mxu1 %v6364_v30 }
 0x157   :  { %5739 = vmatprep.subr.mxu1 %v7725_v0  ;;  %5691 = vmatpush3.msra.mxu0 %v6297_v46  ;;  %v1307_v46 = vand.u32 4294901760, %v6483_v9 }
 0x158   :  { %5740 = vmatpush3.msra.mxu1 %v6250_v22  ;;  %5692 = vmatprep.subr.mxu0 %v7725_v0  ;;  %v6416_v22 = vsub.f32 %v83_v42, %v6400_v48 }
 0x159   :  { %5741 = vmatprep.subr.mxu1 %v7725_v0  ;;  %5693 = vmatpush3.msra.mxu0 %v6301_v49 }
 0x15a   :  { %5742 = vmatpush3.msra.mxu1 %v6255_v25  ;;  %5694 = vmatprep.subr.mxu0 %v7725_v0  ;;  %v80_v25 = vld [vmem:[#allocation2 + $0x68] sm:$0xff]  ;;  %v1272_v1 = vand.u32 4294901760, %v6416_v22 }
 0x15b   :  { %5743 = vmatprep.subr.mxu1 %v7725_v0  ;;  %5695 = vmatpush3.msra.mxu0 %v6314_v55  ;;  %v6431_v63 = vand.u32 4294901760, %v80_v25  ;;  %v1308_v55 = vsub.f32 %v6483_v9, %v1307_v46 }
 0x15c   :  { %5744 = vmatpush3.msra.mxu1 %v6263_v29  ;;  %5696 = vmatprep.subr.mxu0 %v7725_v0  ;;  %v6427_v29 = vsub.f32 %v82_v47, %v6409_v57  ;;  %v1273_v28 = vsub.f32 %v6416_v22, %v1272_v1 }
 0x15d   :  { %5745 = vmatprep.subr.mxu1 %v7725_v0  ;;  %5697 = vmatpush3.msra.mxu0 %v6329_v61  ;;  %v1309_v61 = vand.u32 4294901760, %v1308_v55 }
 0x15e   :  { %5698 = vmatprep.mubr.msk.f32.mxu0 %vm6165_vm0, %v7725_v0  ;;  %5746 = vmatpush3.msra.mxu1 %v6275_v34  ;;  %v6438_v34 = vsub.f32 %v81_v51, %v6418_v58  ;;  %v1274_v39 = vand.u32 4294901760, %v1273_v28 }
 0x15f   :  { %5699 = vmatmul.mubr.f32.vlgmr.msra.gmra.mxu0 %v6357_v35  ;;  %5720 = vmatprep.subr.mxu0 %v7725_v0 }
 0x160   :  { %5747 = vmatprep.subr.mxu1 %v7725_v0  ;;  %5721 = vmatpush3.msra.mxu0 %v718_v27  ;;  %v1279_v27 = vand.u32 4294901760, %v6427_v29 }
 0x161   :  { %5748 = vmatpush3.msra.mxu1 %v6285_v40  ;;  %5722 = vmatprep.subr.mxu0 %v7725_v0  ;;  %v6454_v40 = vsub.f32 %v80_v25, %v6431_v63 }
 0x162   :  { %5749 = vmatprep.subr.mxu1 %v7725_v0  ;;  %5723 = vmatpush3.msra.mxu0 %v725_v32  ;;  %v1286_v32 = vand.u32 4294901760, %v6438_v34 }
 0x163   :  { %5750 = vmatpush3.msra.mxu1 %v6291_v44  ;;  %5724 = vmatprep.subr.mxu0 %v7725_v0  ;;  %v6468_v44 = vsub.f32 %v79_v62, %v6442_v4 }
 0x164   :  { %5751 = vmatprep.subr.mxu1 %v7725_v0  ;;  %5725 = vmatpush3.msra.mxu0 %v732_v38  ;;  %v1280_v38 = vsub.f32 %v6427_v29, %v1279_v27 }
 0x165   :  { %5752 = vmatpush3.msra.mxu1 %v6303_v50  ;;  %5726 = vmatprep.subr.mxu0 %v7725_v0  ;;  %v1293_v50 = vand.u32 4294901760, %v6454_v40 }
 0x166   :  { %5753 = vmatprep.subr.mxu1 %v7725_v0  ;;  %5727 = vmatpush3.msra.mxu0 %v739_v45  ;;  %v1287_v45 = vsub.f32 %v6438_v34, %v1286_v32  ;;  %v1281_v11 = vand.u32 4294901760, %v1280_v38 }
 0x167   :  { %5754 = vmatpush3.msra.mxu1 %v6316_v56  ;;  %5755 = vmatprep.mubr.msk.f32.mxu1 %vm6165_vm0, %v7725_v0  ;;  %v1300_v56 = vand.u32 4294901760, %v6468_v44  ;;  %v1294_v12 = vsub.f32 %v6454_v40, %v1293_v50 }
 0x168   :  { %5728 = vmatprep.subr.mxu0 %v7725_v0  ;;  %5756 = vmatmul.mubr.f32.vlgmr.msra.gmra.mxu1 %v6354_v31 }
 0x169   :  { %5777 = vmatprep.subr.mxu1 %v7725_v0  ;;  %5729 = vmatpush3.msra.mxu0 %v746_v52  ;;  %v1288_v52 = vand.u32 4294901760, %v1287_v45  ;;  %v1301_v49 = vsub.f32 %v6468_v44, %v1300_v56  ;;  %v1295_v13 = vand.u32 4294901760, %v1294_v12 }
 0x16a   :  { %5778 = vmatpush3.msra.mxu1 %v1267_v33  ;;  %5730 = vmatprep.subr.mxu0 %v7725_v0  ;;  %v2202_v33 = vsel %vm567_vm2, %v6223_v7, 0 }
 0x16b   :  { %5779 = vmatprep.subr.mxu1 %v7725_v0  ;;  %5731 = vmatpush3.msra.mxu0 %v753_v54  ;;  %v1314_v54 = vand.u32 4294901760, %v6495_v10 }
 0x16c   :  { %5780 = vmatpush3.msra.mxu1 %v1274_v39  ;;  %5732 = vmatprep.subr.mxu0 %v7725_v0  ;;  %v6748_v39 = vand.u32 4294901760, %v2202_v33 }
 0x16d   :  { %5781 = vmatprep.subr.mxu1 %v7725_v0  ;;  %5733 = vmatpush3.msra.mxu0 %v760_v60  ;;  %v1302_v60 = vand.u32 4294901760, %v1301_v49  ;;  %v1315_v14 = vsub.f32 %v6495_v10, %v1314_v54 }
 0x16e   :  { %5782 = vmatpush3.msra.mxu1 %v1281_v11  ;;  %5734 = vmatprep.subr.mxu0 %v7725_v0  ;;  %v2274_v12 = vsub.f32 %v2202_v33, %v6748_v39 }
 0x16f   :  { %5783 = vmatprep.subr.mxu1 %v7725_v0  ;;  %5735 = vmatpush3.msra.mxu0 %v767_v2  ;;  %v1316_v2 = vand.u32 4294901760, %v1315_v14 }
 0x170   :  { %5736 = vmatprep.mubr.msk.f32.mxu0 %vm6165_vm0, %v7725_v0  ;;  %5784 = vmatpush3.msra.mxu1 %v1288_v52 }
 0x171   :  { %5737 = vmatmul.mubr.f32.vlgmr.msra.gmra.mxu0 %v6354_v31  ;;  %5758 = vmatprep.subr.mxu0 %v7725_v0 }
 0x172   :  { %5785 = vmatprep.subr.mxu1 %v7725_v0  ;;  %5759 = vmatpush3.msra.mxu0 %v6394_v43 }
 0x173   :  { %5786 = vmatpush3.msra.mxu1 %v1295_v13  ;;  %5760 = vmatprep.subr.mxu0 %v7725_v0 }
 0x174   :  { %5787 = vmatprep.subr.mxu1 %v7725_v0  ;;  %5761 = vmatpush3.msra.mxu0 %v6400_v48 }
 0x175   :  { %5788 = vmatpush3.msra.mxu1 %v1302_v60  ;;  %5762 = vmatprep.subr.mxu0 %v7725_v0 }
 0x176   :  { %5789 = vmatprep.subr.mxu1 %v7725_v0  ;;  %5763 = vmatpush3.msra.mxu0 %v6409_v57 }
 0x177   :  { %5790 = vmatpush3.msra.mxu1 %v1309_v61  ;;  %5764 = vmatprep.subr.mxu0 %v7725_v0 }
 0x178   :  { %5791 = vmatprep.subr.mxu1 %v7725_v0  ;;  %5765 = vmatpush3.msra.mxu0 %v6418_v58 }
 0x179   :  { %5792 = vmatpush3.msra.mxu1 %v1316_v2  ;;  %5793 = vmatprep.mubr.msk.f32.mxu1 %vm6165_vm0, %v7725_v0  ;;  %v5170_v2 = vld [vmem:[#allocation2 + $0xd3] ss:$0 sm:$0xff] }
 0x17a   :  { %5766 = vmatprep.subr.mxu0 %v7725_v0  ;;  %5794 = vmatmul.mubr.f32.vlgmr.msra.gmra.mxu1 %v6354_v31 }
 0x17b   :  { %5815 = vmatprep.subr.mxu1 %v7725_v0  ;;  %5767 = vmatpush3.msra.mxu0 %v6431_v63 }
 0x17c   :  { %5816 = vmatpush3.msra.mxu1 %v6394_v43  ;;  %5768 = vmatprep.subr.mxu0 %v7725_v0 }
 0x17d   :  { %5817 = vmatprep.subr.mxu1 %v7725_v0  ;;  %5769 = vmatpush3.msra.mxu0 %v6442_v4 }
 0x17e   :  { %5818 = vmatpush3.msra.mxu1 %v6400_v48  ;;  %5770 = vmatprep.subr.mxu0 %v7725_v0 }
 0x17f   :  { %5819 = vmatprep.subr.mxu1 %v7725_v0  ;;  %5771 = vmatpush3.msra.mxu0 %v6456_v6 }
 0x180   :  { %5820 = vmatpush3.msra.mxu1 %v6409_v57  ;;  %5772 = vmatprep.subr.mxu0 %v7725_v0 }
 0x181   :  { %5821 = vmatprep.subr.mxu1 %v7725_v0  ;;  %5773 = vmatpush3.msra.mxu0 %v6470_v8 }
 0x182   :  { %5774 = vmatprep.mubr.msk.f32.mxu0 %vm6165_vm0, %v7725_v0  ;;  %5822 = vmatpush3.msra.mxu1 %v6418_v58 }
 0x183   :  { %5775 = vmatmul.mubr.f32.vlgmr.msra.gmra.mxu0 %v6373_v37  ;;  %5796 = vmatprep.subr.mxu0 %v7725_v0  ;;  %v6604_v37 = vand.u32 4294901760, %v85_v23 }
 0x184   :  { %5823 = vmatprep.subr.mxu1 %v7725_v0  ;;  %5797 = vmatpush3.msra.mxu0 %v6407_v53 }
 0x185   :  { %5824 = vmatpush3.msra.mxu1 %v6431_v63  ;;  %5798 = vmatprep.subr.mxu0 %v7725_v0  ;;  %v6622_v47 = vsub.f32 %v85_v23, %v6604_v37  ;;  %v2701_v23 = vld [vmem:[#allocation4 + $0x28] sm:$0xff] }
 0x186   :  { %5825 = vmatprep.subr.mxu1 %v7725_v0  ;;  %5799 = vmatpush3.msra.mxu0 %v6416_v22 }
 0x187   :  { %5826 = vmatpush3.msra.mxu1 %v6442_v4  ;;  %5800 = vmatprep.subr.mxu0 %v7725_v0  ;;  %v1840_v53 = vand.u32 4294901760, %v6622_v47 }
 0x188   :  { %5827 = vmatprep.subr.mxu1 %v7725_v0  ;;  %5801 = vmatpush3.msra.mxu0 %v6427_v29 }
 0x189   :  { %5828 = vmatpush3.msra.mxu1 %v6456_v6  ;;  %5802 = vmatprep.subr.mxu0 %v7725_v0 }
 0x18a   :  { %5829 = vmatprep.subr.mxu1 %v7725_v0  ;;  %5803 = vmatpush3.msra.mxu0 %v6438_v34  ;;  %v91_v34 = vld [vmem:[#allocation2 + $0xc0] sm:$0xff] }
 0x18b   :  { %5830 = vmatpush3.msra.mxu1 %v6470_v8  ;;  %5831 = vmatprep.mubr.msk.f32.mxu1 %vm6165_vm0, %v7725_v0  ;;  %v6702_v24 = vand.u32 4294901760, %v91_v34 }
 0x18c   :  { %5804 = vmatprep.subr.mxu0 %v7725_v0  ;;  %5832 = vmatmul.mubr.f32.vlgmr.msra.gmra.mxu1 %v6364_v30  ;;  %v6595_v30 = vand.u32 4294901760, %v86_v18 }
 0x18d   :  { %5853 = vmatprep.subr.mxu1 %v7725_v0  ;;  %5805 = vmatpush3.msra.mxu0 %v6454_v40  ;;  %v6719_v28 = vsub.f32 %v91_v34, %v6702_v24 }
 0x18e   :  { %5854 = vmatpush3.msra.mxu1 %v6394_v43  ;;  %5806 = vmatprep.subr.mxu0 %v7725_v0  ;;  %v6613_v42 = vsub.f32 %v86_v18, %v6595_v30  ;;  %v1826_v43 = vand.u32 4294901760, %v6602_v36 }
 0x18f   :  { %5855 = vmatprep.subr.mxu1 %v7725_v0  ;;  %5807 = vmatpush3.msra.mxu0 %v6468_v44  ;;  %v2317_v38 = vand.u32 4294901760, %v6719_v28 }
 0x190   :  { %5856 = vmatpush3.msra.mxu1 %v6400_v48  ;;  %5808 = vmatprep.subr.mxu0 %v7725_v0  ;;  %v1833_v48 = vand.u32 4294901760, %v6613_v42  ;;  %v1827_v51 = vsub.f32 %v6602_v36, %v1826_v43 }
 0x191   :  { %5857 = vmatprep.subr.mxu1 %v7725_v0  ;;  %5809 = vmatpush3.msra.mxu0 %v6483_v9  ;;  %v2318_v45 = vsub.f32 %v6719_v28, %v2317_v38 }
 0x192   :  { %5858 = vmatpush3.msra.mxu1 %v6409_v57  ;;  %5810 = vmatprep.subr.mxu0 %v7725_v0  ;;  %v1711_v57 = vsel %vm567_vm2, %v602_v21, 0  ;;  %v1828_v19 = vand.u32 4294901760, %v1827_v51  ;;  %v1841_v21 = vsub.f32 %v6622_v47, %v1840_v53  ;;  %v2697_v51 = vld [vmem:[#allocation4 + $0x8] sm:$0xff] }
 0x193   :  { %5859 = vmatprep.subr.mxu1 %v7725_v0  ;;  %5811 = vmatpush3.msra.mxu0 %v6495_v10  ;;  %v6664_v25 = vand.u32 4294901760, %v1711_v57 }
 0x194   :  { %5812 = vmatprep.mubr.msk.f32.mxu0 %vm6165_vm0, %v7725_v0  ;;  %5860 = vmatpush3.msra.mxu1 %v6418_v58  ;;  %v1834_v58 = vsub.f32 %v6613_v42, %v1833_v48  ;;  %v1842_v29 = vand.u32 4294901760, %v1841_v21 }
 0x195   :  { %5813 = vmatmul.mubr.f32.vlgmr.msra.gmra.mxu0 %v6357_v35  ;;  %5834 = vmatprep.subr.mxu0 %v7725_v0  ;;  %v1820_v35 = vsub.f32 %v6593_v26, %v1819_v41  ;;  %v6675_v62 = vsub.f32 %v1711_v57, %v6664_v25 }
 0x196   :  { %5861 = vmatprep.subr.mxu1 %v7725_v0  ;;  %5835 = vmatpush3.msra.mxu0 %v1265_v59  ;;  %v1835_v59 = vand.u32 4294901760, %v1834_v58  ;;  %v2696_v58 = vld [vmem:[#allocation4] sm:$0xff] }
 0x197   :  { %5862 = vmatpush3.msra.mxu1 %v6431_v63  ;;  %5836 = vmatprep.subr.mxu0 %v7725_v0  ;;  %v1821_v22 = vand.u32 4294901760, %v1820_v35  ;;  %v1784_v63 = vand.u32 4294901760, %v6675_v62 }
 0x198   :  { %5863 = vmatprep.subr.mxu1 %v7725_v0  ;;  %5837 = vmatpush3.msra.mxu0 %v1272_v1  ;;  %v92_v1 = vld [vmem:[#allocation2 + $0xc8] sm:$0xff] }
 0x199   :  { %5864 = vmatpush3.msra.mxu1 %v6442_v4  ;;  %5838 = vmatprep.subr.mxu0 %v7725_v0  ;;  %v6696_v3 = vand.u32 4294901760, %v92_v1  ;;  %v90_v4 = vld [vmem:[#allocation2 + $0xb8] sm:$0xff] }
 0x19a   :  { %5865 = vmatprep.subr.mxu1 %v7725_v0  ;;  %5839 = vmatpush3.msra.mxu0 %v1279_v27  ;;  %v6711_v40 = vand.u32 4294901760, %v90_v4 }
 0x19b   :  { %5866 = vmatpush3.msra.mxu1 %v6456_v6  ;;  %5840 = vmatprep.subr.mxu0 %v7725_v0  ;;  %v6709_v5 = vsub.f32 %v92_v1, %v6696_v3  ;;  %v89_v6 = vld [vmem:[#allocation2 + $0xb0] sm:$0xff] }
 0x19c   :  { %5867 = vmatprep.subr.mxu1 %v7725_v0  ;;  %5841 = vmatpush3.msra.mxu0 %v1286_v32  ;;  %v6726_v44 = vsub.f32 %v90_v4, %v6711_v40 }
 0x19d   :  { %5868 = vmatpush3.msra.mxu1 %v6470_v8  ;;  %5869 = vmatprep.mubr.msk.f32.mxu1 %vm6165_vm0, %v7725_v0  ;;  %v2310_v32 = vand.u32 4294901760, %v6709_v5  ;;  %v6728_v8 = vand.u32 4294901760, %v89_v6 }
 0x19e   :  { %5842 = vmatprep.subr.mxu0 %v7725_v0  ;;  %5870 = vmatmul.mubr.f32.vlgmr.msra.gmra.mxu1 %v6354_v31  ;;  %v2324_v7 = vand.u32 4294901760, %v6726_v44 }
 0x19f   :  { %5883 = vmatprep.subr.mxu1 %v7725_v0  ;;  %5843 = vmatpush3.msra.mxu0 %v1293_v50  ;;  %v2311_v50 = vsub.f32 %v6709_v5, %v2310_v32  ;;  %v6746_v9 = vsub.f32 %v89_v6, %v6728_v8 }
 0x1a0   :  { %5884 = vmatpush3.msra.mxu1 %v1821_v22  ;;  %5844 = vmatprep.subr.mxu0 %v7725_v0  ;;  %v2325_v10 = vsub.f32 %v6726_v44, %v2324_v7  ;;  %v6873_v22 = vand.u32 4294901760, %v2697_v51 }
 0x1a1   :  { %5885 = vmatprep.subr.mxu1 %v7725_v0  ;;  %5845 = vmatpush3.msra.mxu0 %v1300_v56  ;;  %v2312_v56 = vand.u32 4294901760, %v2311_v50  ;;  %v2331_v11 = vand.u32 4294901760, %v6746_v9 }
 0x1a2   :  { %5886 = vmatpush3.msra.mxu1 %v1828_v19  ;;  %5846 = vmatprep.subr.mxu0 %v7725_v0  ;;  %v2326_v52 = vand.u32 4294901760, %v2325_v10 }
 0x1a3   :  { %5887 = vmatprep.subr.mxu1 %v7725_v0  ;;  %5847 = vmatpush3.msra.mxu0 %v1307_v46  ;;  %v2319_v46 = vand.u32 4294901760, %v2318_v45  ;;  %v2332_v49 = vsub.f32 %v6746_v9, %v2331_v11 }
 0x1a4   :  { %5888 = vmatpush3.msra.mxu1 %v1835_v59  ;;  %5848 = vmatprep.subr.mxu0 %v7725_v0 }
 0x1a5   :  { %5889 = vmatprep.subr.mxu1 %v7725_v0  ;;  %5849 = vmatpush3.msra.mxu0 %v1314_v54  ;;  %v2275_v54 = vand.u32 4294901760, %v2274_v12  ;;  %v2333_v13 = vand.u32 4294901760, %v2332_v49 }
 0x1a6   :  { %5850 = vmatprep.mubr.msk.f32.mxu0 %vm6165_vm0, %v7725_v0  ;;  %5890 = vmatpush3.msra.mxu1 %v1842_v29 }
 0x1a7   :  { %5891 = vmatprep.mubr.msk.f32.mxu1 %vm6165_vm0, %v7725_v0  ;;  %5851 = vmatmul.mubr.f32.vlgmr.msra.gmra.mxu0 %v6354_v31  ;;  %v1785_v31 = vsub.f32 %v6675_v62, %v1784_v63  ;;  %v2276_v55 = vsub.f32 %v2274_v12, %v2275_v54 }
 0x1a8   :  { %5872 = vmatprep.subr.mxu0 %v7725_v0  ;;  %5892 = vmatmul.mubr.f32.vlgmr.msra.gmra.mxu1 %v6664_v25 }
 0x1a9   :  { %5905 = vmatprep.subr.mxu1 %v7725_v0  ;;  %5873 = vmatpush3.msra.mxu0 %v6580_v17  ;;  %v1786_v27 = vand.u32 4294901760, %v1785_v31  ;;  %v2277_v60 = vand.u32 4294901760, %v2276_v55 }
 0x1aa   :  { %5906 = vmatpush3.msra.mxu1 %v6580_v17  ;;  %5874 = vmatprep.subr.mxu0 %v7725_v0 }
 0x1ab   :  { %5907 = vmatprep.subr.mxu1 %v7725_v0  ;;  %5875 = vmatpush3.msra.mxu0 %v6586_v20 }
 0x1ac   :  { %5908 = vmatpush3.msra.mxu1 %v6586_v20  ;;  %5876 = vmatprep.subr.mxu0 %v7725_v0 }
 0x1ad   :  { %5909 = vmatprep.subr.mxu1 %v7725_v0  ;;  %5877 = vmatpush3.msra.mxu0 %v6595_v30 }
 0x1ae   :  { %5910 = vmatpush3.msra.mxu1 %v6595_v30  ;;  %5878 = vmatprep.subr.mxu0 %v7725_v0 }
 0x1af   :  { %5911 = vmatprep.subr.mxu1 %v7725_v0  ;;  %5879 = vmatpush3.msra.mxu0 %v6604_v37 }
 0x1b0   :  { %5880 = vmatprep.mubr.msk.f32.mxu0 %vm6165_vm0, %v7725_v0  ;;  %5912 = vmatpush3.msra.mxu1 %v6604_v37 }
 0x1b1   :  { %5913 = vmatprep.mubr.msk.f32.mxu1 %vm6165_vm0, %v7725_v0  ;;  %5881 = vmatmul.mubr.f32.vlgmr.msra.gmra.mxu0 %v1786_v27 }
 0x1b2   :  { %5894 = vmatprep.subr.mxu0 %v7725_v0  ;;  %5914 = vmatmul.mubr.f32.vlgmr.msra.gmra.mxu1 %v1784_v63  ;;  %v65_v63 = vld [vmem:[%s7719_s1] sm:$0xff] }
 0x1b3   :  { %5927 = vmatprep.subr.mxu1 %v7725_v0  ;;  %5895 = vmatpush3.msra.mxu0 %v6593_v26  ;;  %v2712_v4 = vsel %vm2710_vm4, %v65_v63, 0 }
 0x1b4   :  { %5928 = vmatpush3.msra.mxu1 %v6580_v17  ;;  %5896 = vmatprep.subr.mxu0 %v7725_v0 }
 0x1b5   :  { %5929 = vmatprep.subr.mxu1 %v7725_v0  ;;  %5897 = vmatpush3.msra.mxu0 %v6602_v36  ;;  %v2700_v36 = vld [vmem:[#allocation4 + $0x20] sm:$0xff] }
 0x1b6   :  { %5930 = vmatpush3.msra.mxu1 %v6586_v20  ;;  %5898 = vmatprep.subr.mxu0 %v7725_v0 }
 0x1b7   :  { %5931 = vmatprep.subr.mxu1 %v7725_v0  ;;  %5899 = vmatpush3.msra.mxu0 %v6613_v42 }
 0x1b8   :  { %5932 = vmatpush3.msra.mxu1 %v6595_v30  ;;  %5900 = vmatprep.subr.mxu0 %v7725_v0  ;;  %v6852_v30 = vand.u32 4294901760, %v2701_v23 }
 0x1b9   :  { %5933 = vmatprep.subr.mxu1 %v7725_v0  ;;  %5901 = vmatpush3.msra.mxu0 %v6622_v47  ;;  %v2698_v47 = vld [vmem:[#allocation4 + $0x10] sm:$0xff] }
 0x1ba   :  { %5902 = vmatprep.mubr.msk.f32.mxu0 %vm6165_vm0, %v7725_v0  ;;  %5934 = vmatpush3.msra.mxu1 %v6604_v37  ;;  %v6854_v37 = vand.u32 4294901760, %v2700_v36  ;;  %v6857_v42 = vsub.f32 %v2701_v23, %v6852_v30 }
 0x1bb   :  { %5935 = vmatprep.mubr.msk.f32.mxu1 %vm6165_vm0, %v7725_v0  ;;  %5903 = vmatmul.mubr.f32.vlgmr.msra.gmra.mxu0 %v6675_v62  ;;  %v6887_v62 = vsub.f32 %v2697_v51, %v6873_v22  ;;  %v2703_v51 = vld [vmem:[#allocation4 + $0x38] sm:$0xff] }
 0x1bc   :  { %5916 = vmatprep.subr.mxu0 %v7725_v0  ;;  %5936 = vmatmul.mubr.f32.vlgmr.msra.gmra.mxu1 %v6664_v25  ;;  %v6863_v35 = vsub.f32 %v2700_v36, %v6854_v37  ;;  %v6971_v63 = vand.u32 4294901760, %v2703_v51 }
 0x1bd   :  { %5917 = vmatpush3.msra.mxu0 %v1819_v41  ;;  %5924 = vmatprep.mubr.msk.f32.mxu0 %vm6165_vm0, %v7725_v0  ;;  %v2699_v41 = vld [vmem:[#allocation4 + $0x18] sm:$0xff] }
 0x1be   :  { %5918 = vmatprep.subr.mxu0 %v7725_v0  ;;  %5949 = vmatprep.subr.mxu1 %v7725_v0  ;;  %v2830_v19 = vand.u32 4294901760, %v6863_v35 }
 0x1bf   :  { %5919 = vmatpush3.msra.mxu0 %v1826_v43  ;;  %5950 = vmatpush3.msra.mxu1 %v2312_v56  ;;  %v6860_v43 = vand.u32 4294901760, %v2699_v41 }
 0x1c0   :  { %5920 = vmatprep.subr.mxu0 %v7725_v0  ;;  %5951 = vmatprep.subr.mxu1 %v7725_v0  ;;  %v2831_v34 = vsub.f32 %v6863_v35, %v2830_v19 }
 0x1c1   :  { %5921 = vmatpush3.msra.mxu0 %v1833_v48  ;;  %5952 = vmatpush3.msra.mxu1 %v2319_v46  ;;  %v6866_v48 = vand.u32 4294901760, %v2698_v47  ;;  %v6870_v57 = vsub.f32 %v2699_v41, %v6860_v43 }
 0x1c2   :  { %5922 = vmatprep.subr.mxu0 %v7725_v0  ;;  %5953 = vmatprep.subr.mxu1 %v7725_v0 }
 0x1c3   :  { %5923 = vmatpush3.msra.mxu0 %v1840_v53  ;;  %5954 = vmatpush3.msra.mxu1 %v2326_v52  ;;  %v2824_v53 = vand.u32 4294901760, %v6857_v42  ;;  %v6877_v21 = vsub.f32 %v2698_v47, %v6866_v48  ;;  %v2836_v29 = vand.u32 4294901760, %v6870_v57  ;;  %v2709_v52 = vld [vmem:[#allocation4 + $0x68] sm:$0xff] }
 0x1c4   :  { %5925 = vmatmul.mubr.f32.vlgmr.msra.gmra.mxu0 %v6664_v25  ;;  %5938 = vmatprep.subr.mxu0 %v7725_v0  ;;  %v6880_v25 = vand.u32 4294901760, %v2696_v58 }
 0x1c5   :  { %5939 = vmatpush3.msra.mxu0 %v6696_v3  ;;  %5946 = vmatprep.mubr.msk.f32.mxu0 %vm6165_vm0, %v7725_v0  ;;  %v2825_v59 = vsub.f32 %v6857_v42, %v2824_v53  ;;  %v2842_v31 = vand.u32 4294901760, %v6877_v21 }
 0x1c6   :  { %5940 = vmatprep.subr.mxu0 %v7725_v0  ;;  %5955 = vmatprep.subr.mxu1 %v7725_v0 }
 0x1c7   :  { %5941 = vmatpush3.msra.mxu0 %v6702_v24  ;;  %5956 = vmatpush3.msra.mxu1 %v2333_v13  ;;  %v2826_v27 = vand.u32 4294901760, %v2825_v59  ;;  %v2708_v13 = vld [vmem:[#allocation4 + $0x60] sm:$0xff] }
 0x1c8   :  { %5942 = vmatprep.subr.mxu0 %v7725_v0  ;;  %5957 = vmatprep.mubr.msk.f32.mxu1 %vm6165_vm0, %v7725_v0  ;;  %v6931_v55 = vand.u32 4294901760, %v2708_v13 }
 0x1c9   :  { %5943 = vmatpush3.msra.mxu0 %v6711_v40  ;;  %5971 = vmatprep.subr.mxu1 %v7725_v0 }
 0x1ca   :  { %5944 = vmatprep.subr.mxu0 %v7725_v0  ;;  %5958 = vmatmul.mubr.f32.vlgmr.msra.gmra.mxu1 %v6748_v39 }
 0x1cb   :  { %5945 = vmatpush3.msra.mxu0 %v6728_v8  ;;  %5972 = vmatpush3.msra.mxu1 %v6696_v3 }
 0x1cc   :  { %5947 = vmatmul.mubr.f32.vlgmr.msra.gmra.mxu0 %v2277_v60  ;;  %5960 = vmatprep.subr.mxu0 %v7725_v0  ;;  %v2707_v60 = vld [vmem:[#allocation4 + $0x58] sm:$0xff] }
 0x1cd   :  { %5961 = vmatpush3.msra.mxu0 %v6709_v5  ;;  %5973 = vmatprep.subr.mxu1 %v7725_v0  ;;  %v2837_v5 = vsub.f32 %v6870_v57, %v2836_v29 }
 0x1ce   :  { %5962 = vmatprep.subr.mxu0 %v7725_v0  ;;  %5974 = vmatpush3.msra.mxu1 %v6702_v24 }
 0x1cf   :  { %5963 = vmatpush3.msra.mxu0 %v6719_v28  ;;  %5975 = vmatprep.subr.mxu1 %v7725_v0  ;;  %v2832_v28 = vand.u32 4294901760, %v2831_v34 }
 0x1d0   :  { %5964 = vmatprep.subr.mxu0 %v7725_v0  ;;  %5976 = vmatpush3.msra.mxu1 %v6711_v40 }
 0x1d1   :  { %5965 = vmatpush3.msra.mxu0 %v6726_v44  ;;  %5968 = vmatprep.mubr.msk.f32.mxu0 %vm6165_vm0, %v7725_v0 }
 0x1d2   :  { %5966 = vmatprep.subr.mxu0 %v7725_v0  ;;  %5977 = vmatprep.subr.mxu1 %v7725_v0 }
 0x1d3   :  { %5967 = vmatpush3.msra.mxu0 %v6746_v9  ;;  %5978 = vmatpush3.msra.mxu1 %v6728_v8 }
 0x1d4   :  { %5969 = vmatmul.mubr.f32.vlgmr.msra.gmra.mxu0 %v2274_v12  ;;  %5982 = vmatprep.subr.mxu0 %v7725_v0 }
 0x1d5   :  { %5979 = vmatprep.mubr.msk.f32.mxu1 %vm6165_vm0, %v7725_v0  ;;  %5983 = vmatpush3.msra.mxu0 %v2310_v32  ;;  %v2843_v32 = vsub.f32 %v6877_v21, %v2842_v31 }
 0x1d6   :  { %5993 = vmatprep.subr.mxu1 %v7725_v0  ;;  %5980 = vmatmul.mubr.f32.vlgmr.msra.gmra.mxu1 %v2275_v54  ;;  %v6928_v54 = vand.u32 4294901760, %v2709_v52 }
 0x1d7   :  { %5984 = vmatprep.subr.mxu0 %v7725_v0  ;;  %5994 = vmatpush3.msra.mxu1 %v6696_v3  ;;  %v6898_v3 = vsub.f32 %v2696_v58, %v6880_v25 }
 0x1d8   :  { %5985 = vmatpush3.msra.mxu0 %v2317_v38  ;;  %5995 = vmatprep.subr.mxu1 %v7725_v0  ;;  %v2838_v38 = vand.u32 4294901760, %v2837_v5 }
 0x1d9   :  { %5986 = vmatprep.subr.mxu0 %v7725_v0  ;;  %5996 = vmatpush3.msra.mxu1 %v6702_v24  ;;  %v2854_v44 = vand.u32 4294901760, %v6898_v3 }
 0x1da   :  { %5987 = vmatpush3.msra.mxu0 %v2324_v7  ;;  %5997 = vmatprep.subr.mxu1 %v7725_v0  ;;  %v2844_v7 = vand.u32 4294901760, %v2843_v32 }
 0x1db   :  { %5988 = vmatprep.subr.mxu0 %v7725_v0  ;;  %5998 = vmatpush3.msra.mxu1 %v6711_v40  ;;  %v2848_v40 = vand.u32 4294901760, %v6887_v62  ;;  %v2855_v9 = vsub.f32 %v6898_v3, %v2854_v44 }
 0x1dc   :  { %5989 = vmatpush3.msra.mxu0 %v2331_v11  ;;  %5990 = vmatprep.mubr.msk.f32.mxu0 %vm6165_vm0, %v7725_v0 }
 0x1dd   :  { %5999 = vmatprep.subr.mxu1 %v7725_v0  ;;  %5991 = vmatmul.mubr.f32.vlgmr.msra.gmra.mxu0 %v6748_v39  ;;  %v2849_v50 = vsub.f32 %v6887_v62, %v2848_v40  ;;  %v2856_v56 = vand.u32 4294901760, %v2855_v9 }
 0x1de   :  { %6000 = vmatpush3.msra.mxu1 %v6728_v8  ;;  %6001 = vmatprep.mubr.msk.f32.mxu1 %vm6165_vm0, %v7725_v0  ;;  %v6910_v8 = vand.u32 4294901760, %v2712_v4 }
 0x1df   :  { %6002 = vmatmul.mubr.f32.vlgmr.msra.gmra.mxu1 %v6748_v39  ;;  %2784 = vmatprep.mubr.f32.mxu0 %v7725_v0  ;;  %v2850_v45 = vand.u32 4294901760, %v2849_v50 }
 0x1e0   :  { %2890 = vmatprep.mubr.f32.mxu1 %v7725_v0  ;;  %2741 = vmatprep.subr.mxu0 %v6852_v30  ;;  %v2786_v39 = vsub.f32 %v2712_v4, %v6910_v8 }
 0x1e1   :  { %2743 = vmatpush1.msra.mxu0 %v6854_v37  ;;  %2827 = vmatprep.subr.mxu1 %v2826_v27 }
 0x1e2   :  { %2745 = vmatprep.subr.mxu0 %v6860_v43  ;;  %2833 = vmatpush1.msra.mxu1 %v2832_v28  ;;  %v2787_v10 = vand.u32 4294901760, %v2786_v39 }
 0x1e3   :  { %2747 = vmatpush1.msra.mxu0 %v6866_v48  ;;  %2839 = vmatprep.subr.mxu1 %v2838_v38 }
 0x1e4   :  { %2749 = vmatprep.subr.mxu0 %v6873_v22  ;;  %2845 = vmatpush1.msra.mxu1 %v2844_v7  ;;  %v2788_v11 = vsub.f32 %v2786_v39, %v2787_v10 }
 0x1e5   :  { %2751 = vmatpush1.msra.mxu0 %v6880_v25  ;;  %2851 = vmatprep.subr.mxu1 %v2850_v45 }
 0x1e6   :  { %2926 = vmatprep.subr.mxu0 %v6857_v42  ;;  %2857 = vmatpush1.msra.mxu1 %v2856_v56  ;;  %v2789_v46 = vand.u32 4294901760, %v2788_v11 }
 0x1e7   :  { %3010 = vmatprep.subr.mxu1 %v6852_v30  ;;  %2892 = vmatmul.mubr.f32.vlgmr.msra.gmra.mxu1 %v6910_v8 }
 0x1e8   :  { %3012 = vmatpush1.msra.mxu1 %v6854_v37  ;;  %3053 = vmatprep.mubr.f32.mxu1 %v7725_v0 }
 0x1e9   :  { %3014 = vmatprep.subr.mxu1 %v6860_v43  ;;  %2790 = vmatmul.mubr.f32.vlgmr.msra.gmra.mxu0 %v2789_v46 }
 0x1ea   :  { %3016 = vmatpush1.msra.mxu1 %v6866_v48  ;;  %2929 = vmatpush1.msra.mxu0 %v6863_v35 }
 0x1eb   :  { %3018 = vmatprep.subr.mxu1 %v6873_v22  ;;  %2932 = vmatprep.subr.mxu0 %v6870_v57 }
 0x1ec   :  { %3020 = vmatpush1.msra.mxu1 %v6880_v25  ;;  %2935 = vmatpush1.msra.mxu0 %v6877_v21 }
 0x1ed   :  { %3180 = vmatprep.subr.mxu1 %v6852_v30  ;;  %2938 = vmatprep.subr.mxu0 %v6887_v62 }
 0x1ee   :  { %3057 = vmatmul.mubr.f32.vlgmr.msra.gmra.mxu1 %v2787_v10  ;;  %2941 = vmatpush1.msra.mxu0 %v6898_v3 }
 0x1ef   :  { %3182 = vmatpush1.msra.mxu1 %v6854_v37  ;;  %2974 = vmatprep.mubr.f32.mxu0 %v7725_v0 }
 0x1f0   :  { %3092 = vmatprep.subr.mxu0 %v2824_v53  ;;  %3184 = vmatprep.subr.mxu1 %v6860_v43 }
 0x1f1   :  { %2977 = vmatmul.mubr.f32.vlgmr.msra.gmra.mxu0 %v2786_v39  ;;  %3186 = vmatpush1.msra.mxu1 %v6866_v48 }
 0x1f2   :  { %3096 = vmatpush1.msra.mxu0 %v2830_v19  ;;  %3188 = vmatprep.subr.mxu1 %v6873_v22 }
 0x1f3   :  { %3100 = vmatprep.subr.mxu0 %v2836_v29  ;;  %3190 = vmatpush1.msra.mxu1 %v6880_v25 }
 0x1f4   :  { %3104 = vmatpush1.msra.mxu0 %v2842_v31  ;;  %3223 = vmatprep.mubr.f32.mxu1 %v7725_v0 }
 0x1f5   :  { %3108 = vmatprep.subr.mxu0 %v2848_v40  ;;  %3145 = vmatprep.mubr.f32.mxu0 %v7725_v0 }
 0x1f6   :  { %3112 = vmatpush1.msra.mxu0 %v2854_v44  ;;  %3225 = vmatmul.mubr.f32.vlgmr.msra.gmra.mxu1 %v6910_v8 }
 0x1f7   :  { %3147 = vmatmul.mubr.f32.vlgmr.msra.gmra.mxu0 %v6910_v8  ;;  %3259 = vmatprep.subr.mxu0 %v6928_v54  ;;  %v5172_v8 = vld [vmem:[#allocation2 + $0xd4] ss:$0 sm:$0xff] }
 0x1f8   :  { %3422 = vmatprep.mubr.f32.mxu1 %v7725_v0  ;;  %3261 = vmatpush1.msra.mxu0 %v6931_v55 }
 0x1f9   :  { %3306 = vmatprep.mubr.f32.mxu0 %v7725_v0 }
 0x206   :  { %v806_v14 = vpop.f32.mrf.mxu1 }
 0x208   :  { %v5681_v61 = vpop.f32.mrf.mxu1 }
 0x209   :  { %v6938_v61 = vand.u32 4294901760, %v2707_v60 }
 0x20b   :  { %3263 = vmatprep.subr.mxu0 %v6938_v61 }
 0x20e   :  { %v695_v15 = vpop.f32.mrf.mxu0 }
 0x20f   :  { %v696_v16 = vadd.f32 %v5170_v2, %v695_v15  ;;  %v2706_v2 = vld [vmem:[#allocation4 + $0x50] sm:$0xff]  ;;  %v6943_v15 = vsub.f32 %v2708_v13, %v6931_v55 }
 0x210   :  { %v5662_v17 = vpop.f32.mrf.mxu0 }
 0x211   :  { %v807_v18 = vadd.f32 %v806_v14, %v696_v16  ;;  %v6936_v14 = vsub.f32 %v2709_v52, %v6928_v54  ;;  %v6945_v16 = vand.u32 4294901760, %v2706_v2  ;;  %v2705_v17 = vld [vmem:[#allocation4 + $0x48] sm:$0xff]  ;;  %v3350_v36 = vand.u32 4294901760, %v6943_v15 }
 0x212   :  { %v6953_v23 = vand.u32 4294901760, %v2705_v17 }
 0x213   :  { %v6958_v41 = vsub.f32 %v2706_v2, %v6945_v16  ;;  %v3351_v37 = vsub.f32 %v6943_v15, %v3350_v36  ;;  %3265 = vmatpush1.msra.mxu0 %v6945_v16 }
 0x214   :  { %v6969_v59 = vsub.f32 %v2705_v17, %v6953_v23  ;;  %3267 = vmatprep.subr.mxu0 %v6953_v23 }
 0x215   :  { %v3362_v4 = vand.u32 4294901760, %v6958_v41  ;;  %v3352_v19 = vand.u32 4294901760, %v3351_v37 }
 0x216   :  { %v975_v20 = vpop.f32.mrf.mxu1  ;;  %v3368_v53 = vand.u32 4294901760, %v6969_v59 }
 0x217   :  { %v3363_v32 = vsub.f32 %v6958_v41, %v3362_v4 }
 0x218   :  { %v5719_v26 = vpop.f32.mrf.mxu1  ;;  %v3369_v35 = vsub.f32 %v6969_v59, %v3368_v53 }
 0x219   :  { %v2704_v26 = vld [vmem:[#allocation4 + $0x40] sm:$0xff]  ;;  %v3364_v21 = vand.u32 4294901760, %v3363_v32 }
 0x21a   :  { %v6960_v47 = vand.u32 4294901760, %v2704_v26  ;;  %v3370_v62 = vand.u32 4294901760, %v3369_v35 }
 0x21c   :  { %3269 = vmatpush1.msra.mxu0 %v6960_v47 }
 0x21d   :  { %3271 = vmatprep.subr.mxu0 %v6971_v63 }
 0x21f   :  { %v894_v1 = vpop.f32.mrf.mxu0 }
 0x220   :  { %v895_v24 = vadd.f32 %v894_v1, %v807_v18  ;;  %v3344_v18 = vand.u32 4294901760, %v6936_v14  ;;  %v2702_v1 = vld [vmem:[#allocation4 + $0x30] sm:$0xff] }
 0x221   :  { %v5700_v6 = vpop.f32.mrf.mxu0  ;;  %v6983_v27 = vand.u32 4294901760, %v2702_v1 }
 0x222   :  { %v6912_v33 = vadd.f32 %v975_v20, %v895_v24  ;;  %v6951_v20 = vsub.f32 %v2707_v60, %v6938_v61  ;;  %v3345_v30 = vsub.f32 %v6936_v14, %v3344_v18  ;;  %v6981_v24 = vsub.f32 %v2704_v26, %v6960_v47 }
 0x223   :  { %v7011_v48 = vsub.f32 %v2702_v1, %v6983_v27  ;;  %3273 = vmatpush1.msra.mxu0 %v6983_v27 }
 0x224   :  { %v3356_v58 = vand.u32 4294901760, %v6951_v20  ;;  %v3346_v28 = vand.u32 4294901760, %v3345_v30  ;;  %v3374_v43 = vand.u32 4294901760, %v6981_v24  ;;  %3456 = vmatprep.subr.mxu0 %v6936_v14  ;;  %v3796_v14 = vld [vmem:[#allocation6 + $0x98] sm:$0xff] }
 0x225   :  { %v3386_v50 = vand.u32 4294901760, %v7011_v48 }
 0x226   :  { %v3357_v42 = vsub.f32 %v6951_v20, %v3356_v58  ;;  %v3375_v57 = vsub.f32 %v6981_v24, %v3374_v43  ;;  %3347 = vmatprep.subr.mxu1 %v3346_v28 }
 0x227   :  { %v3387_v31 = vsub.f32 %v7011_v48, %v3386_v50  ;;  %3353 = vmatpush1.msra.mxu1 %v3352_v19 }
 0x228   :  { %v6921_v12 = vpop.f32.mrf.mxu1  ;;  %v3358_v22 = vand.u32 4294901760, %v3357_v42  ;;  %v3376_v40 = vand.u32 4294901760, %v3375_v57 }
 0x229   :  { %v3388_v7 = vand.u32 4294901760, %v3387_v31 }
 0x22a   :  { %v5757_v49 = vpop.f32.mrf.mxu1  ;;  %3359 = vmatprep.subr.mxu1 %v3358_v22 }
 0x22b   :  { %3365 = vmatpush1.msra.mxu1 %v3364_v21 }
 0x22c   :  { %3371 = vmatprep.subr.mxu1 %v3370_v62 }
 0x22d   :  { %3377 = vmatpush1.msra.mxu1 %v3376_v40 }
 0x231   :  { %v1070_v34 = vpop.f32.mrf.mxu0 }
 0x232   :  { %v1071_v5 = vadd.f32 %v1070_v34, %v6912_v33  ;;  %v6999_v33 = vsub.f32 %v2703_v51, %v6971_v63 }
 0x233   :  { %v5738_v6 = vpop.f32.mrf.mxu0 }
 0x234   :  { %v7002_v38 = vadd.f32 %v6921_v12, %v1071_v5  ;;  %v3380_v29 = vand.u32 4294901760, %v6999_v33 }
 0x236   :  { %v3381_v25 = vsub.f32 %v6999_v33, %v3380_v29  ;;  %v5171_v5 = vmul.f32 -1.442695, %v7002_v38 }
 0x238   :  { %v3382_v44 = vand.u32 4294901760, %v3381_v25  ;;  %6082 = vpow2.f32 %v5171_v5 }
 0x23a   :  { %v1353_v3 = vpop.f32.mrf.mxu1  ;;  %3383 = vmatprep.subr.mxu1 %v3382_v44 }
 0x23b   :  { %3389 = vmatpush1.msra.mxu1 %v3388_v7  ;;  %v5174_v7 = vld [vmem:[#allocation2 + $0xd5] ss:$0 sm:$0xff] }
 0x23c   :  { %v5795_v9 = vpop.f32.mrf.mxu1  ;;  %3544 = vmatprep.subr.mxu1 %v6928_v54 }
 0x23d   :  { %v5175_v9 = vld [vmem:[#allocation2 + $0xd6] ss:$0 sm:$0xff] }
 0x243   :  { %v1242_v39 = vpop.f32.mrf.mxu0 }
 0x244   :  { %v1243_v45 = vadd.f32 %v5172_v8, %v1242_v39 }
 0x245   :  { %v5776_v56 = vpop.f32.mrf.mxu0 }
 0x246   :  { %v1354_v10 = vadd.f32 %v1353_v3, %v1243_v45  ;;  %v6083_v3 = vpop.eup %6082 }
 0x247   :  { %v1156_v38 = vadd.f32 1.0, %v6083_v3 }
 0x24c   :  { %v1522_v11 = vpop.f32.mrf.mxu1 }
 0x24e   :  { %v5833_v12 = vpop.f32.mrf.mxu1 }
 0x255   :  { %v1441_v46 = vpop.f32.mrf.mxu0 }
 0x256   :  { %v1442_v42 = vadd.f32 %v1441_v46, %v1354_v10 }
 0x257   :  { %v5814_v52 = vpop.f32.mrf.mxu0 }
 0x258   :  { %v1523_v35 = vadd.f32 %v1522_v11, %v1442_v42 }
 0x25e   :  { %v1696_v49 = vpop.f32.mrf.mxu1 }
 0x260   :  { %v5871_v13 = vpop.f32.mrf.mxu1 }
 0x267   :  { %v1617_v60 = vpop.f32.mrf.mxu0 }
 0x268   :  { %v1879_v2 = vpop.f32.mrf.mxu1  ;;  %v1618_v19 = vadd.f32 %v1617_v60, %v1523_v35 }
 0x269   :  { %v5852_v17 = vpop.f32.mrf.mxu0 }
 0x26a   :  { %v5893_v26 = vpop.f32.mrf.mxu1  ;;  %v1697_v22 = vadd.f32 %v1696_v49, %v1618_v19 }
 0x26c   :  { %v5173_v25 = vmul.f32 -1.442695, %v1697_v22 }
 0x26e   :  { %6084 = vpow2.f32 %v5173_v25 }
 0x26f   :  { %6086 = vrcp.f32 %v1156_v38 }
 0x271   :  { %v1788_v51 = vpop.f32.mrf.mxu0 }
 0x272   :  { %v2036_v30 = vpop.f32.mrf.mxu1  ;;  %v1789_v8 = vadd.f32 %v5174_v7, %v1788_v51 }
 0x273   :  { %v5882_v1 = vpop.f32.mrf.mxu0 }
 0x274   :  { %v5915_v34 = vpop.f32.mrf.mxu1  ;;  %v1880_v56 = vadd.f32 %v1879_v2, %v1789_v8  ;;  %v3793_v8 = vld [vmem:[#allocation6 + $0x80] sm:$0xff] }
 0x27b   :  { %v1959_v37 = vpop.f32.mrf.mxu0  ;;  %v6085_v13 = vpop.eup %6084 }
 0x27c   :  { %v2194_v6 = vpop.f32.mrf.mxu1  ;;  %v1960_v46 = vadd.f32 %v1959_v37, %v1880_v56  ;;  %v1703_v1 = vadd.f32 1.0, %v6085_v13  ;;  %v3807_v13 = vld [vmem:[#allocation6 + $0xf0] sm:$0xff] }
 0x27d   :  { %v5904_v28 = vpop.f32.mrf.mxu0 }
 0x27e   :  { %v5937_v32 = vpop.f32.mrf.mxu1  ;;  %v2037_v60 = vadd.f32 %v2036_v30, %v1960_v46  ;;  %6088 = vrcp.f32 %v1703_v1  ;;  %v6092_v30 = vld [vmem:[%s7720_s2] sm:$0xff] }
 0x27f   :  { %v6087_v32 = vpop.eup %6086 }
 0x284   :  { %v2119_v57 = vpop.f32.mrf.mxu0 }
 0x285   :  { %v2120_v34 = vadd.f32 %v2119_v57, %v2037_v60 }
 0x286   :  { %v5926_v21 = vpop.f32.mrf.mxu0 }
 0x287   :  { %v2195_v2 = vadd.f32 %v2194_v6, %v2120_v34  ;;  %v3791_v34 = vld [vmem:[#allocation6 + $0x70] sm:$0xff] }
 0x28a   :  { %v2370_v62 = vpop.f32.mrf.mxu1 }
 0x28b   :  { %v6089_v37 = vpop.eup %6088 }
 0x28c   :  { %v2279_v31 = vpop.f32.mrf.mxu0  ;;  %v5959_v40 = vpop.f32.mrf.mxu1  ;;  %v2692_v21 = vsub.f32 1.0, %v6089_v37 }
 0x28d   :  { %v2280_v39 = vadd.f32 %v5175_v9, %v2279_v31 }
 0x28e   :  { %v5948_v44 = vpop.f32.mrf.mxu0 }
 0x28f   :  { %v2371_v10 = vadd.f32 %v2370_v62, %v2280_v39  ;;  %v2694_v62 = vmul.f32 %v6092_v30, %v6089_v37  ;;  %v3808_v39 = vld [vmem:[#allocation6 + $0xf8] sm:$0xff]  ;;  %v3790_v37 = vld [vmem:[#allocation6 + $0x68] sm:$0xff] }
 0x290   :  { %v7173_v1 = vand.u32 4294901760, %v3808_v39 }
 0x294   :  { %v2450_v45 = vpop.f32.mrf.mxu0 }
 0x295   :  { %v2451_v52 = vadd.f32 %v2450_v45, %v2371_v10 }
 0x296   :  { %v5970_v11 = vpop.f32.mrf.mxu0  ;;  %v2527_v12 = vpop.f32.mrf.mxu1 }
 0x297   :  { %v2528_v17 = vadd.f32 %v2527_v12, %v2451_v52  ;;  %v3792_v11 = vld [vmem:[#allocation6 + $0x78] sm:$0xff] }
 0x298   :  { %v5981_v49 = vpop.f32.mrf.mxu1 }
 0x29d   :  { %v2610_v26 = vpop.f32.mrf.mxu0 }
 0x29e   :  { %v2611_v5 = vadd.f32 %v2610_v26, %v2528_v17  ;;  %v7171_v26 = vand.u32 4294901760, %v3793_v8 }
 0x29f   :  { %v2685_v42 = vpop.f32.mrf.mxu1  ;;  %v5992_v28 = vpop.f32.mrf.mxu0 }
 0x2a0   :  { %v2686_v51 = vadd.f32 %v2685_v42, %v2611_v5 }
 0x2a1   :  { %v6003_v35 = vpop.f32.mrf.mxu1 }
 0x2a2   :  { %v2689_v19 = vmul.f32 %v6087_v32, %v2686_v51  ;;  %v7182_v51 = vand.u32 4294901760, %v3792_v11  ;;  %v7186_v35 = vsub.f32 %v3793_v8, %v7171_v26 }
 0x2a4   :  { %v2690_v22 = vadd.f32 %v2689_v19, %v2195_v2  ;;  %v7189_v2 = vsub.f32 %v3808_v39, %v7173_v1  ;;  %v7191_v19 = vand.u32 4294901760, %v3807_v13  ;;  %v7195_v30 = vsub.f32 %v3792_v11, %v7182_v51  ;;  %v3789_v11 = vld [vmem:[#allocation6 + $0x60] sm:$0xff] }
 0x2a6   :  { %6090 = vtanh.f32 %v2690_v22  ;;  %v3806_v22 = vld [vmem:[#allocation6 + $0xe8] sm:$0xff] }
 0x2b3   :  { %v6091_v25 = vpop.eup %6090 }
 0x2b4   :  { %v2693_v57 = vmul.f32 %v6091_v25, %v2692_v21 }
 0x2b6   :  { %v2695_v31 = vadd.f32 %v2694_v62, %v2693_v57  ;;  %v7197_v62 = vand.u32 4294901760, %v3791_v34 }
 0x2b8   :  { %v3232_v40 = vsel %vm567_vm2, %v2695_v31, 0  ;;  %v7733_v31 = vand.u32 4294901760, %v7186_v35 }
 0x2b9   :  { %v7052_v3 = vand.u32 4294901760, %v3232_v40 }
 0x2bb   :  { %7827 = vst [vmem:[#allocation9_spill] sm:$0xff] %v7052_v3  ;;  %3424 = vmatmul.mubr.f32.vlgmr.msra.gmra.mxu1 %v7052_v3  ;;  %v7056_v6 = vsub.f32 %v3232_v40, %v7052_v3  ;;  %v7732_v40 = vand.u32 4294901760, %v7189_v2 }
 0x2bc   :  { %3546 = vmatpush1.msra.mxu1 %v6931_v55  ;;  %3591 = vmatprep.mubr.f32.mxu1 %v7725_v0 }
 0x2bd   :  { %7828 = vst [vmem:[#allocation10_spill] sm:$0xff] %v7056_v6  ;;  %3548 = vmatprep.subr.mxu1 %v6938_v61  ;;  %v7062_v44 = vand.u32 4294901760, %v7056_v6 }
 0x2be   :  { %3550 = vmatpush1.msra.mxu1 %v6945_v16 }
 0x2bf   :  { %7829 = vst [vmem:[#allocation11_spill] sm:$0xff] %v7062_v44  ;;  %3552 = vmatprep.subr.mxu1 %v6953_v23  ;;  %v3310_v7 = vsub.f32 %v7056_v6, %v7062_v44 }
 0x2c0   :  { %3554 = vmatpush1.msra.mxu1 %v6960_v47 }
 0x2c1   :  { %3556 = vmatprep.subr.mxu1 %v6971_v63  ;;  %v7070_v9 = vand.u32 4294901760, %v3310_v7  ;;  %v7206_v7 = vsub.f32 %v3807_v13, %v7191_v19 }
 0x2c2   :  { %3558 = vmatpush1.msra.mxu1 %v6983_v27 }
 0x2c3   :  { %7830 = vst [vmem:[#allocation12_spill] sm:$0xff] %v7070_v9  ;;  %3595 = vmatmul.mubr.f32.vlgmr.msra.gmra.mxu1 %v7062_v44  ;;  %3722 = vmatprep.subr.mxu1 %v6928_v54  ;;  %v3812_v54 = vld [vmem:[#allocation6 + $0x118] sm:$0xff] }
 0x2c4   :  { %3312 = vmatmul.mubr.f32.vlgmr.msra.gmra.mxu0 %v7070_v9  ;;  %3724 = vmatpush1.msra.mxu1 %v6931_v55  ;;  %v7112_v55 = vand.u32 4294901760, %v3812_v54 }
 0x2c5   :  { %3459 = vmatpush1.msra.mxu0 %v6943_v15  ;;  %3726 = vmatprep.subr.mxu1 %v6938_v61  ;;  %v7114_v61 = vand.u32 4294901760, %v3796_v14  ;;  %v3811_v15 = vld [vmem:[#allocation6 + $0x110] sm:$0xff] }
 0x2c6   :  { %3462 = vmatprep.subr.mxu0 %v6951_v20  ;;  %3728 = vmatpush1.msra.mxu1 %v6945_v16  ;;  %7831 = vst [vmem:[#allocation13_spill] sm:$0xff] %v7112_v55  ;;  %v7117_v16 = vsub.f32 %v3812_v54, %v7112_v55  ;;  %v3795_v20 = vld [vmem:[#allocation6 + $0x90] sm:$0xff]  ;;  %v7729_v54 = vand.u32 4294901760, %v7195_v30 }
 0x2c7   :  { %3465 = vmatpush1.msra.mxu0 %v6958_v41  ;;  %3730 = vmatprep.subr.mxu1 %v6953_v23  ;;  %v7123_v23 = vsub.f32 %v3796_v14, %v7114_v61  ;;  %v3810_v41 = vld [vmem:[#allocation6 + $0x108] sm:$0xff]  ;;  %v7211_v14 = vsub.f32 %v3791_v34, %v7197_v62 }
 0x2c8   :  { %3468 = vmatprep.subr.mxu0 %v6969_v59  ;;  %3732 = vmatpush1.msra.mxu1 %v6960_v47  ;;  %7832 = vst [vmem:[#allocation14_spill] sm:$0xff] %v7117_v16  ;;  %v7744_v47 = vand.u32 4294901760, %v7117_v16  ;;  %v7132_v59 = vand.u32 4294901760, %v3810_v41  ;;  %v3959_v8 = vsub.f32 %v7195_v30, %v7729_v54  ;;  %v3786_v54 = vld [vmem:[#allocation6 + $0x48] sm:$0xff] }
 0x2c9   :  { %3471 = vmatpush1.msra.mxu0 %v6981_v24  ;;  %3734 = vmatprep.subr.mxu1 %v6971_v63  ;;  %v3794_v63 = vld [vmem:[#allocation6 + $0x88] sm:$0xff]  ;;  %v7727_v39 = vand.u32 4294901760, %v7211_v14 }
 0x2ca   :  { %3474 = vmatprep.subr.mxu0 %v6999_v33  ;;  %3510 = vmatprep.mubr.f32.mxu0 %v7725_v0 }
 0x2cb   :  { %3477 = vmatpush1.msra.mxu0 %v7011_v48  ;;  %3736 = vmatpush1.msra.mxu1 %v6983_v27  ;;  %v7139_v27 = vand.u32 4294901760, %v3794_v63 }
 0x2cc   :  { %3769 = vmatprep.mubr.f32.mxu1 %v7725_v0  ;;  %3513 = vmatmul.mubr.f32.vlgmr.msra.gmra.mxu0 %v7056_v6 }
 0x2cd   :  { %3628 = vmatprep.subr.mxu0 %v3344_v18  ;;  %3771 = vmatmul.mubr.f32.vlgmr.msra.gmra.mxu1 %v7052_v3  ;;  %v7119_v18 = vand.u32 4294901760, %v3811_v15  ;;  %v7155_v38 = vsub.f32 %v3794_v63, %v7139_v27 }
 0x2ce   :  { %3632 = vmatpush1.msra.mxu0 %v3350_v36  ;;  %3689 = vmatprep.mubr.f32.mxu0 %v7725_v0  ;;  %v7125_v36 = vand.u32 4294901760, %v3795_v20 }
 0x2cf   :  { %3636 = vmatprep.subr.mxu0 %v3356_v58  ;;  %v7130_v58 = vsub.f32 %v3811_v15, %v7119_v18  ;;  %v7736_v49 = vand.u32 4294901760, %v7155_v38  ;;  %v7213_v15 = vand.u32 4294901760, %v3806_v22 }
 0x2d0   :  { %3640 = vmatpush1.msra.mxu0 %v3362_v4  ;;  %v7742_v4 = vand.u32 4294901760, %v7123_v23  ;;  %v7137_v24 = vsub.f32 %v3795_v20, %v7125_v36  ;;  %v7215_v20 = vand.u32 4294901760, %v3790_v37 }
 0x2d1   :  { %3644 = vmatprep.subr.mxu0 %v3368_v53  ;;  %v3809_v53 = vld [vmem:[#allocation6 + $0x100] sm:$0xff]  ;;  %v7741_v33 = vand.u32 4294901760, %v7130_v58  ;;  %v3945_v28 = vsub.f32 %v7155_v38, %v7736_v49 }
 0x2d2   :  { %3648 = vmatpush1.msra.mxu0 %v3374_v43  ;;  %v4043_v43 = vsub.f32 %v7117_v16, %v7744_v47  ;;  %v3931_v48 = vsub.f32 %v7123_v23, %v7742_v4  ;;  %v7161_v10 = vand.u32 4294901760, %v3809_v53  ;;  %v3784_v47 = vld [vmem:[#allocation6 + $0x38] sm:$0xff] }
 0x2d3   :  { %3652 = vmatprep.subr.mxu0 %v3380_v29  ;;  %v7739_v29 = vand.u32 4294901760, %v7137_v24  ;;  %v4050_v56 = vsub.f32 %v7130_v58, %v7741_v33  ;;  %v3946_v25 = vand.u32 4294901760, %v3945_v28  ;;  %v3966_v28 = vsub.f32 %v7211_v14, %v7727_v39 }
 0x2d4   :  { %3656 = vmatpush1.msra.mxu0 %v3386_v50  ;;  %v7152_v50 = vsub.f32 %v3810_v41, %v7132_v59  ;;  %v4044_v45 = vand.u32 4294901760, %v4043_v43  ;;  %v3932_v12 = vand.u32 4294901760, %v3931_v48  ;;  %v7169_v17 = vsub.f32 %v3809_v53, %v7161_v10  ;;  %v3805_v41 = vld [vmem:[#allocation6 + $0xe0] sm:$0xff] }
 0x2d5   :  { %3691 = vmatmul.mubr.f32.vlgmr.msra.gmra.mxu0 %v7052_v3  ;;  %5362 = vmatprep.subr.mxu0 %v7112_v55  ;;  %v3938_v46 = vsub.f32 %v7137_v24, %v7739_v29  ;;  %v4051_v60 = vand.u32 4294901760, %v4050_v56  ;;  %v3952_v53 = vsub.f32 %v7186_v35, %v7733_v31  ;;  %v4071_v43 = vsub.f32 %v7189_v2, %v7732_v40  ;;  %v3800_v29 = vld [vmem:[#allocation6 + $0xb8] sm:$0xff]  ;;  %v3783_v3 = vld [vmem:[#allocation6 + $0x30] sm:$0xff] }
 0x2d6   :  { %5363 = vmatpush3.msra.mxu0 %v7114_v61  ;;  %v7737_v52 = vand.u32 4294901760, %v7152_v50  ;;  %5397 = vmatprep.subr.mxu1 %v4044_v45  ;;  %v7735_v32 = vand.u32 4294901760, %v7169_v17  ;;  %v7728_v48 = vand.u32 4294901760, %v7206_v7  ;;  %v7231_v45 = vsub.f32 %v3806_v22, %v7213_v15 }
 0x2d7   :  { %5364 = vmatprep.subr.mxu0 %v7119_v18  ;;  %5398 = vmatpush3.msra.mxu1 %v3932_v12  ;;  %v3939_v5 = vand.u32 4294901760, %v3938_v46  ;;  %v7234_v56 = vsub.f32 %v3790_v37, %v7215_v20  ;;  %v3804_v12 = vld [vmem:[#allocation6 + $0xd8] sm:$0xff]  ;;  %v3953_v46 = vand.u32 4294901760, %v3952_v53  ;;  %v4072_v13 = vand.u32 4294901760, %v4071_v43  ;;  %v3787_v43 = vld [vmem:[#allocation6 + $0x50] sm:$0xff] }
 0x2d8   :  { %5365 = vmatpush3.msra.mxu0 %v7125_v36  ;;  %v4057_v42 = vsub.f32 %v7152_v50, %v7737_v52  ;;  %5399 = vmatprep.subr.mxu1 %v4051_v60  ;;  %v4064_v57 = vsub.f32 %v7169_v17, %v7735_v32  ;;  %7833 = vst [vmem:[#allocation15_spill] sm:$0xff] %v7231_v45  ;;  %v7240_v34 = vand.u32 4294901760, %v3805_v41  ;;  %v7730_v22 = vand.u32 4294901760, %v7231_v45 }
 0x2d9   :  { %5366 = vmatprep.subr.mxu0 %v7132_v59  ;;  %5400 = vmatpush3.msra.mxu1 %v3939_v5  ;;  %7834 = vst [vmem:[#allocation16_spill] sm:$0xff] %v7234_v56  ;;  %v4078_v60 = vsub.f32 %v7206_v7, %v7728_v48  ;;  %v3788_v5 = vld [vmem:[#allocation6 + $0x58] sm:$0xff]  ;;  %v7731_v37 = vand.u32 4294901760, %v7234_v56  ;;  %v7253_v53 = vand.u32 4294901760, %v3804_v12  ;;  %v7333_v9 = vand.u32 4294901760, %v3800_v29 }
 0x2da   :  { %5367 = vmatpush3.msra.mxu0 %v7139_v27  ;;  %v4058_v21 = vand.u32 4294901760, %v4057_v42  ;;  %v4065_v63 = vand.u32 4294901760, %v4064_v57  ;;  %v3960_v42 = vand.u32 4294901760, %v3959_v8  ;;  %v7249_v57 = vsub.f32 %v3805_v41, %v7240_v34 }
 0x2db   :  { %5368 = vmatprep.subr.mxu0 %v7161_v10  ;;  %v3967_v8 = vand.u32 4294901760, %v3966_v28  ;;  %v4085_v0 = vsub.f32 %v7231_v45, %v7730_v22  ;;  %v7269_v48 = vsub.f32 %v3804_v12, %v7253_v53  ;;  %v3802_v28 = vld [vmem:[#allocation6 + $0xc8] sm:$0xff]  ;;  %7848 = vst [vmem:[#allocation30_spill] sm:$0xff] %v7333_v9 }
 0x2dc   :  { %5369 = vmatpush3.msra.mxu0 %v7171_v26  ;;  %5401 = vmatprep.subr.mxu1 %v4058_v21  ;;  %v3803_v21 = vld [vmem:[#allocation6 + $0xd0] sm:$0xff]  ;;  %7835 = vst [vmem:[#allocation17_spill] sm:$0xff] %v7249_v57  ;;  %v7734_v41 = vand.u32 4294901760, %v7249_v57 }
 0x2dd   :  { %5370 = vmatprep.subr.mxu0 %v7173_v1  ;;  %5402 = vmatpush3.msra.mxu1 %v3946_v25  ;;  %v4079_v25 = vand.u32 4294901760, %v4078_v60  ;;  %v7262_v60 = vand.u32 4294901760, %v3788_v5  ;;  %7837 = vst [vmem:[#allocation19_spill] sm:$0xff] %v7269_v48  ;;  %v4086_v22 = vand.u32 4294901760, %v4085_v0  ;;  %v7740_v31 = vand.u32 4294901760, %v7269_v48 }
 0x2de   :  { %5371 = vmatpush3.msra.mxu0 %v7182_v51  ;;  %5403 = vmatprep.subr.mxu1 %v4065_v63  ;;  %v7251_v63 = vand.u32 4294901760, %v3789_v11 }
 0x2df   :  { %5372 = vmatprep.subr.mxu0 %v7191_v19  ;;  %5404 = vmatpush3.msra.mxu1 %v3953_v46  ;;  %v3973_v46 = vsub.f32 %v7234_v56, %v7731_v37  ;;  %v7275_v40 = vsub.f32 %v3788_v5, %v7262_v60 }
 0x2e0   :  { %5373 = vmatpush3.msra.mxu0 %v7197_v62  ;;  %5405 = vmatprep.subr.mxu1 %v4072_v13  ;;  %v7266_v39 = vsub.f32 %v3789_v11, %v7251_v63  ;;  %v7271_v13 = vand.u32 4294901760, %v3803_v21  ;;  %v4092_v11 = vsub.f32 %v7249_v57, %v7734_v41  ;;  %v3801_v41 = vld [vmem:[#allocation6 + $0xc0] sm:$0xff] }
 0x2e1   :  { %5374 = vmatprep.subr.mxu0 %v7213_v15  ;;  %5406 = vmatpush3.msra.mxu1 %v3960_v42  ;;  %v3974_v37 = vand.u32 4294901760, %v3973_v46  ;;  %7838 = vst [vmem:[#allocation20_spill] sm:$0xff] %v7275_v40  ;;  %v7277_v42 = vand.u32 4294901760, %v3787_v43  ;;  %v7743_v0 = vand.u32 4294901760, %v7275_v40  ;;  %v7295_v46 = vand.u32 4294901760, %v3786_v54 }
 0x2e2   :  { %5375 = vmatpush3.msra.mxu0 %v7215_v20  ;;  %7836 = vst [vmem:[#allocation18_spill] sm:$0xff] %v7266_v39  ;;  %5407 = vmatprep.subr.mxu1 %v4079_v25  ;;  %v7738_v12 = vand.u32 4294901760, %v7266_v39  ;;  %v7286_v25 = vsub.f32 %v3803_v21, %v7271_v13  ;;  %v4093_v32 = vand.u32 4294901760, %v4092_v11 }
 0x2e3   :  { %5376 = vmatprep.subr.mxu0 %v7240_v34  ;;  %5408 = vmatpush3.msra.mxu1 %v3967_v8  ;;  %v7291_v5 = vsub.f32 %v3787_v43, %v7277_v42  ;;  %v7293_v8 = vand.u32 4294901760, %v3802_v28  ;;  %7842 = vst [vmem:[#allocation24_spill] sm:$0xff] %v7295_v46  ;;  %v3987_v49 = vsub.f32 %v7275_v40, %v7743_v0  ;;  %v7320_v0 = vand.u32 4294901760, %v3801_v41  ;;  %v3782_v40 = vld [vmem:[#allocation6 + $0x28] sm:$0xff] }
 0x2e4   :  { %5377 = vmatpush3.msra.mxu0 %v7251_v63  ;;  %7839 = vst [vmem:[#allocation21_spill] sm:$0xff] %v7286_v25  ;;  %5409 = vmatprep.subr.mxu1 %v4086_v22  ;;  %v3980_v21 = vsub.f32 %v7266_v39, %v7738_v12  ;;  %v4099_v22 = vsub.f32 %v7269_v48, %v7740_v31  ;;  %v7747_v43 = vand.u32 4294901760, %v7286_v25  ;;  %v3785_v12 = vld [vmem:[#allocation6 + $0x40] sm:$0xff] }
 0x2e5   :  { %5378 = vmatprep.subr.mxu0 %v7253_v53  ;;  %7840 = vst [vmem:[#allocation22_spill] sm:$0xff] %v7291_v5  ;;  %7841 = vst [vmem:[#allocation23_spill] sm:$0xff] %v7293_v8  ;;  %5410 = vmatpush3.msra.mxu1 %v3974_v37  ;;  %v7751_v52 = vand.u32 4294901760, %v7291_v5  ;;  %v7311_v37 = vsub.f32 %v3802_v28, %v7293_v8  ;;  %v7314_v11 = vsub.f32 %v3786_v54, %v7295_v46 }
 0x2e6   :  { %5379 = vmatpush3.msra.mxu0 %v7262_v60  ;;  %5411 = vmatprep.subr.mxu1 %v4093_v32  ;;  %v3981_v31 = vand.u32 4294901760, %v3980_v21  ;;  %v4100_v33 = vand.u32 4294901760, %v4099_v22  ;;  %v4106_v4 = vsub.f32 %v7286_v25, %v7747_v43  ;;  %7845 = vst [vmem:[#allocation27_spill] sm:$0xff] %v7320_v0  ;;  %v3988_v28 = vand.u32 4294901760, %v3987_v49  ;;  %v3799_v21 = vld [vmem:[#allocation6 + $0xb0] sm:$0xff] }
 0x2e7   :  { %5380 = vmatprep.subr.mxu0 %v7271_v13  ;;  %7843 = vst [vmem:[#allocation25_spill] sm:$0xff] %v7311_v37  ;;  %7844 = vst [vmem:[#allocation26_spill] sm:$0xff] %v7314_v11  ;;  %v3994_v54 = vsub.f32 %v7291_v5, %v7751_v52  ;;  %v7758_v6 = vand.u32 4294901760, %v7311_v37  ;;  %v7759_v32 = vand.u32 4294901760, %v7314_v11  ;;  %v7329_v44 = vsub.f32 %v3801_v41, %v7320_v0 }
 0x2e8   :  { %5381 = vmatpush3.msra.mxu0 %v7277_v42  ;;  %5412 = vmatpush3.msra.mxu1 %v3981_v31  ;;  %v4107_v22 = vand.u32 4294901760, %v4106_v4  ;;  %v7331_v43 = vand.u32 4294901760, %v3785_v12  ;;  %v7342_v31 = vand.u32 4294901760, %v3784_v47  ;;  %v7349_v25 = vsub.f32 %v3800_v29, %v7333_v9 }
 0x2e9   :  { %5382 = vmatprep.subr.mxu0 %v7293_v8  ;;  %7846 = vst [vmem:[#allocation28_spill] sm:$0xff] %v7329_v44  ;;  %5413 = vmatprep.subr.mxu1 %v4100_v33  ;;  %v3995_v49 = vand.u32 4294901760, %v3994_v54  ;;  %v4113_v52 = vsub.f32 %v7311_v37, %v7758_v6  ;;  %v4001_v4 = vsub.f32 %v7314_v11, %v7759_v32  ;;  %v7764_v41 = vand.u32 4294901760, %v7329_v44  ;;  %v3798_v54 = vld [vmem:[#allocation6 + $0xa8] sm:$0xff] }
 0x2ea   :  { %5383 = vmatpush3.msra.mxu0 %v7295_v46  ;;  %7847 = vst [vmem:[#allocation29_spill] sm:$0xff] %v7331_v43  ;;  %7849 = vst [vmem:[#allocation31_spill] sm:$0xff] %v7342_v31  ;;  %5414 = vmatpush3.msra.mxu1 %v3988_v28  ;;  %v7346_v5 = vsub.f32 %v3785_v12, %v7331_v43  ;;  %v7351_v33 = vand.u32 4294901760, %v3799_v21  ;;  %v7355_v11 = vsub.f32 %v3784_v47, %v7342_v31 }
 0x2eb   :  { %5384 = vmatprep.subr.mxu0 %v7320_v0  ;;  %7851 = vst [vmem:[#allocation33_spill] sm:$0xff] %v7349_v25  ;;  %5415 = vmatprep.subr.mxu1 %v4107_v22  ;;  %v4114_v6 = vand.u32 4294901760, %v4113_v52  ;;  %v4002_v32 = vand.u32 4294901760, %v4001_v4  ;;  %v7357_v28 = vand.u32 4294901760, %v3783_v3  ;;  %v4120_v29 = vsub.f32 %v7329_v44, %v7764_v41  ;;  %v3797_v41 = vld [vmem:[#allocation6 + $0xa0] sm:$0xff] }
 0x2ec   :  { %7850 = vst [vmem:[#allocation32_spill] sm:$0xff] %v7346_v5  ;;  %7852 = vst [vmem:[#allocation34_spill] sm:$0xff] %v7351_v33  ;;  %5385 = vmatpush3.msra.mxu0 %v7331_v43  ;;  %5416 = vmatpush3.msra.mxu1 %v3995_v49  ;;  %v7771_v12 = vand.u32 4294901760, %v7346_v5  ;;  %v7366_v22 = vsub.f32 %v3799_v21, %v7351_v33  ;;  %v7373_v49 = vand.u32 4294901760, %v3798_v54  ;;  %v7375_v4 = vand.u32 4294901760, %v3782_v40 }
 0x2ed   :  { %7853 = vst [vmem:[#allocation35_spill] sm:$0xff] %v7355_v11  ;;  %7854 = vst [vmem:[#allocation36_spill] sm:$0xff] %v7357_v28  ;;  %5386 = vmatprep.subr.mxu0 %v7333_v9  ;;  %5417 = vmatprep.subr.mxu1 %v4114_v6  ;;  %v7371_v52 = vsub.f32 %v3783_v3, %v7357_v28  ;;  %v4121_v37 = vand.u32 4294901760, %v4120_v29  ;;  %v7859_v6 = vand.u32 4294901760, %v7349_v25  ;;  %v7860_v44 = vand.u32 4294901760, %v7355_v11 }
 0x2ee   :  { %7855 = vst [vmem:[#allocation37_spill] sm:$0xff] %v7366_v22  ;;  %5387 = vmatpush3.msra.mxu0 %v7342_v31  ;;  %7857 = vst [vmem:[#allocation39_spill] sm:$0xff] %v7373_v49  ;;  %5418 = vmatpush3.msra.mxu1 %v4002_v32  ;;  %v4008_v21 = vsub.f32 %v7346_v5, %v7771_v12  ;;  %v7391_v32 = vsub.f32 %v3798_v54, %v7373_v49  ;;  %v3781_v12 = vld [vmem:[#allocation6 + $0x20] sm:$0xff] }
 0x2ef   :  { %7856 = vst [vmem:[#allocation38_spill] sm:$0xff] %v7371_v52  ;;  %7858 = vst [vmem:[#allocation40_spill] sm:$0xff] %v7375_v4  ;;  %5388 = vmatprep.subr.mxu0 %v7351_v33  ;;  %v4127_v47 = vsub.f32 %v7349_v25, %v7859_v6  ;;  %v4015_v31 = vsub.f32 %v7355_v11, %v7860_v44  ;;  %v7780_v33 = vand.u32 4294901760, %v7371_v52  ;;  %5419 = vmatprep.subr.mxu1 %v4121_v37 }
 0x2f0   :  { %5389 = vmatpush3.msra.mxu0 %v7357_v28  ;;  %7861 = vst [vmem:[#allocation41_spill] sm:$0xff] %v7391_v32  ;;  %v7394_v29 = vsub.f32 %v3782_v40, %v7375_v4  ;;  %v4009_v6 = vand.u32 4294901760, %v4008_v21  ;;  %v7863_v25 = vand.u32 4294901760, %v7366_v22  ;;  %v7400_v28 = vand.u32 4294901760, %v3797_v41 }
 0x2f1   :  { %5390 = vmatprep.subr.mxu0 %v7373_v49  ;;  %v4128_v3 = vand.u32 4294901760, %v4127_v47  ;;  %v4016_v44 = vand.u32 4294901760, %v4015_v31  ;;  %v4022_v40 = vsub.f32 %v7371_v52, %v7780_v33  ;;  %v7782_v54 = vand.u32 4294901760, %v7391_v32 }
 0x2f2   :  { %7862 = vst [vmem:[#allocation42_spill] sm:$0xff] %v7394_v29  ;;  %v4134_v5 = vsub.f32 %v7366_v22, %v7863_v25  ;;  %7864 = vst [vmem:[#allocation43_spill] sm:$0xff] %v7400_v28  ;;  %5391 = vmatpush3.msra.mxu0 %v7375_v4  ;;  %v7781_v11 = vand.u32 4294901760, %v7394_v29  ;;  %5420 = vmatpush3.msra.mxu1 %v4009_v6  ;;  %v7409_v47 = vsub.f32 %v3797_v41, %v7400_v28 }
 0x2f3   :  { %v7411_v21 = vand.u32 4294901760, %v3781_v12  ;;  %5392 = vmatprep.subr.mxu0 %v7400_v28  ;;  %5421 = vmatprep.subr.mxu1 %v4128_v3  ;;  %v4023_v25 = vand.u32 4294901760, %v4022_v40  ;;  %v4141_v31 = vsub.f32 %v7391_v32, %v7782_v54 }
 0x2f4   :  { %v4135_v37 = vand.u32 4294901760, %v4134_v5  ;;  %7865 = vst [vmem:[#allocation44_spill] sm:$0xff] %v7409_v47  ;;  %v4029_v33 = vsub.f32 %v7394_v29, %v7781_v11  ;;  %5422 = vmatpush3.msra.mxu1 %v4016_v44  ;;  %v7784_v5 = vand.u32 4294901760, %v7409_v47 }
 0x2f5   :  { %7866 = vst [vmem:[#allocation45_spill] sm:$0xff] %v7411_v21  ;;  %v7422_v41 = vsub.f32 %v3781_v12, %v7411_v21  ;;  %5393 = vmatpush3.msra.mxu0 %v7411_v21  ;;  %v4142_v6 = vand.u32 4294901760, %v4141_v31 }
 0x2f6   :  { %5423 = vmatprep.subr.mxu1 %v4135_v37  ;;  %v4030_v3 = vand.u32 4294901760, %v4029_v33  ;;  %5432 = vmatprep.subr.mxu0 %v7117_v16  ;;  %v4148_v40 = vsub.f32 %v7409_v47, %v7784_v5  ;;  %v2791_v33 = vpop.f32.mrf.mxu0 }
 0x2f7   :  { %7867 = vst [vmem:[#allocation46_spill] sm:$0xff] %v7422_v41  ;;  %5424 = vmatpush3.msra.mxu1 %v4023_v25  ;;  %v7795_v11 = vand.u32 4294901760, %v7422_v41  ;;  %v2893_v25 = vpop.f32.mrf.mxu1 }
 0x2f8   :  { %5425 = vmatprep.subr.mxu1 %v4142_v6  ;;  %v4149_v44 = vand.u32 4294901760, %v4148_v40  ;;  %v2793_v31 = vpop.f32.mrf.mxu0  ;;  %v2894_v22 = vadd.f32 %v2893_v25, %v2791_v33 }
 0x2f9   :  { %5426 = vmatpush3.msra.mxu1 %v4030_v3  ;;  %v4036_v12 = vsub.f32 %v7422_v41, %v7795_v11  ;;  %v2895_v54 = vpop.f32.mrf.mxu1 }
 0x2fa   :  { %5427 = vmatprep.subr.mxu1 %v4149_v44  ;;  %v2978_v16 = vpop.f32.mrf.mxu0  ;;  %v2896_v44 = vadd.f32 %v2895_v54, %v2793_v31 }
 0x2fb   :  { %v4037_v37 = vand.u32 4294901760, %v4036_v12  ;;  %v3058_v5 = vpop.f32.mrf.mxu1 }
 0x2fc   :  { %v2980_v47 = vpop.f32.mrf.mxu0 }
 0x2fd   :  { %5428 = vmatpush3.msra.mxu1 %v4037_v37  ;;  %v3060_v29 = vpop.f32.mrf.mxu1  ;;  %v2979_v37 = vadd.f32 %v2978_v16, %v2894_v22  ;;  %v2981_v21 = vadd.f32 %v2980_v47, %v2896_v44 }
 0x2fe   :  { %5467 = vmatprep.subr.mxu1 %v7112_v55  ;;  %v3148_v6 = vpop.f32.mrf.mxu0 }
 0x2ff   :  { %v3226_v3 = vpop.f32.mrf.mxu1  ;;  %v3059_v9 = vadd.f32 %v3058_v5, %v2979_v37  ;;  %v3061_v39 = vadd.f32 %v3060_v29, %v2981_v21  ;;  %v7872_v29 = vld [vmem:[#allocation17_spill] sm:$0xff]  ;;  %v7873_v21 = vld [vmem:[#allocation27_spill] sm:$0xff] }
 0x300   :  { %v3150_v40 = vpop.f32.mrf.mxu0  ;;  %v7879_v37 = vld [vmem:[#allocation31_spill] sm:$0xff] }
 0x301   :  { %v3228_v52 = vpop.f32.mrf.mxu1  ;;  %v3149_v46 = vadd.f32 %v3148_v6, %v3059_v9  ;;  %v3151_v25 = vadd.f32 %v3150_v40, %v3061_v39  ;;  %v7875_v6 = vld [vmem:[#allocation29_spill] sm:$0xff]  ;;  %v7877_v40 = vld [vmem:[#allocation30_spill] sm:$0xff] }
 0x303   :  { %v3227_v22 = vadd.f32 %v3226_v3, %v3149_v46  ;;  %v7876_v3 = vld [vmem:[#allocation19_spill] sm:$0xff] }
 0x37b   :  { %v3425_v11 = vpop.f32.mrf.mxu1 }
 0x37d   :  { %v3427_v55 = vpop.f32.mrf.mxu1 }
 0x383   :  { %v3596_v4 = vpop.f32.mrf.mxu1 }
 0x384   :  { %v3313_v32 = vpop.f32.mrf.mxu0 }
 0x385   :  { %v3426_v28 = vadd.f32 %v3425_v11, %v3313_v32  ;;  %v3598_v57 = vpop.f32.mrf.mxu1  ;;  %v3229_v32 = vadd.f32 %v3228_v52, %v3151_v25  ;;  %v7869_v52 = vld [vmem:[#allocation23_spill] sm:$0xff]  ;;  %v7881_v25 = vld [vmem:[#allocation34_spill] sm:$0xff] }
 0x386   :  { %v3315_v12 = vpop.f32.mrf.mxu0 }
 0x387   :  { %v3428_v48 = vadd.f32 %v3427_v55, %v3315_v12  ;;  %v7878_v12 = vld [vmem:[#allocation20_spill] sm:$0xff] }
 0x38c   :  { %v3514_v41 = vpop.f32.mrf.mxu0 }
 0x38d   :  { %v3515_v43 = vadd.f32 %v3514_v41, %v3426_v28  ;;  %v3772_v8 = vpop.f32.mrf.mxu1  ;;  %v7874_v41 = vld [vmem:[#allocation18_spill] sm:$0xff] }
 0x38e   :  { %v3516_v49 = vpop.f32.mrf.mxu0 }
 0x38f   :  { %v3517_v0 = vadd.f32 %v3516_v49, %v3428_v48  ;;  %v3597_v56 = vadd.f32 %v3596_v4, %v3515_v43  ;;  %v3774_v11 = vpop.f32.mrf.mxu1  ;;  %v7868_v43 = vld [vmem:[#allocation15_spill] sm:$0xff]  ;;  %v7870_v49 = vld [vmem:[#allocation16_spill] sm:$0xff] }
 0x390   :  { %v7871_v4 = vld [vmem:[#allocation24_spill] sm:$0xff] }
 0x391   :  { %v3599_v31 = vadd.f32 %v3598_v57, %v3517_v0 }
 0x395   :  { %v3692_v33 = vpop.f32.mrf.mxu0 }
 0x396   :  { %v3693_v54 = vadd.f32 %v3692_v33, %v3597_v56  ;;  %v7880_v33 = vld [vmem:[#allocation21_spill] sm:$0xff] }
 0x397   :  { %v3694_v16 = vpop.f32.mrf.mxu0 }
 0x398   :  { %v3773_v45 = vadd.f32 %v3772_v8, %v3693_v54  ;;  %v3695_v47 = vadd.f32 %v3694_v16, %v3599_v31  ;;  %v7882_v54 = vld [vmem:[#allocation22_spill] sm:$0xff]  ;;  %v7883_v31 = vld [vmem:[#allocation36_spill] sm:$0xff]  ;;  %v7884_v16 = vld [vmem:[#allocation25_spill] sm:$0xff] }
 0x39a   :  { %v3813_v44 = vmul.f32 %v3773_v45, %v3227_v22  ;;  %v3775_v5 = vadd.f32 %v3774_v11, %v3695_v47  ;;  %v7885_v22 = vld [vmem:[#allocation39_spill] sm:$0xff]  ;;  %v7886_v47 = vld [vmem:[#allocation26_spill] sm:$0xff]  ;;  %v7887_v11 = vld [vmem:[#allocation40_spill] sm:$0xff] }
 0x39c   :  { %v7434_v55 = vand.u32 4294901760, %v3813_v44  ;;  %v3814_v28 = vmul.f32 %v3775_v5, %v3229_v32  ;;  %v7888_v32 = vld [vmem:[#allocation28_spill] sm:$0xff] }
 0x39d   :  { %v7890_v5 = vld [vmem:[#allocation32_spill] sm:$0xff] }
 0x39e   :  { %v7437_v48 = vsub.f32 %v3813_v44, %v7434_v55  ;;  %v7439_v9 = vand.u32 4294901760, %v3814_v28  ;;  %v7889_v44 = vld [vmem:[#allocation43_spill] sm:$0xff] }
 0x3a0   :  { %v3912_v39 = vsub.f32 %v3814_v28, %v7439_v9  ;;  %4152 = vmatprep.mubr.f32.mxu1 %v7439_v9  ;;  %v3919_v56 = vand.u32 4294901760, %v7437_v48  ;;  %v7891_v28 = vld [vmem:[#allocation45_spill] sm:$0xff] }
 0x3a1   :  { %4154 = vmatmul.mubr.f32.vlgmr.msra.gmra.mxu1 %v7434_v55 }
 0x3a2   :  { %5468 = vmatpush3.msra.mxu1 %v7114_v61  ;;  %v3913_v45 = vand.u32 4294901760, %v3912_v39  ;;  %v3920_v57 = vsub.f32 %v7437_v48, %v3919_v56 }
 0x3a3   :  { %5469 = vmatprep.subr.mxu1 %v7119_v18 }
 0x3a4   :  { %5470 = vmatpush3.msra.mxu1 %v7125_v36  ;;  %4396 = vmatprep.mubr.f32.mxu1 %v3913_v45  ;;  %v3914_v0 = vsub.f32 %v3912_v39, %v3913_v45  ;;  %v3921_v46 = vand.u32 4294901760, %v3920_v57  ;;  %v7893_v45 = vld [vmem:[#allocation13_spill] sm:$0xff]  ;;  %v7894_v57 = vld [vmem:[#allocation35_spill] sm:$0xff] }
 0x3a5   :  { %5471 = vmatprep.subr.mxu1 %v7132_v59 }
 0x3a6   :  { %5472 = vmatpush3.msra.mxu1 %v7139_v27  ;;  %v3915_v8 = vand.u32 4294901760, %v3914_v0  ;;  %v7895_v0 = vld [vmem:[#allocation37_spill] sm:$0xff] }
 0x3a7   :  { %5473 = vmatprep.subr.mxu1 %v7161_v10 }
 0x3a8   :  { %5474 = vmatpush3.msra.mxu1 %v7171_v26  ;;  %3916 = vmatprep.mubr.f32.mxu0 %v3915_v8  ;;  %v7896_v8 = vld [vmem:[#allocation38_spill] sm:$0xff] }
 0x3a9   :  { %5475 = vmatprep.subr.mxu1 %v7173_v1  ;;  %3922 = vmatmul.mubr.f32.vlgmr.msra.gmra.mxu0 %v3921_v46  ;;  %v7897_v46 = vld [vmem:[#allocation41_spill] sm:$0xff] }
 0x3aa   :  { %5433 = vmatpush3.msra.mxu0 %v7123_v23  ;;  %5476 = vmatpush3.msra.mxu1 %v7182_v51 }
 0x3ab   :  { %5434 = vmatprep.subr.mxu0 %v7130_v58  ;;  %4289 = vmatprep.mubr.f32.mxu0 %v3912_v39  ;;  %v7892_v39 = vld [vmem:[#allocation33_spill] sm:$0xff] }
 0x3ac   :  { %5477 = vmatprep.subr.mxu1 %v7191_v19  ;;  %5435 = vmatpush3.msra.mxu0 %v7137_v24 }
 0x3ad   :  { %5478 = vmatpush3.msra.mxu1 %v7197_v62  ;;  %5436 = vmatprep.subr.mxu0 %v7152_v50 }
 0x3ae   :  { %5479 = vmatprep.subr.mxu1 %v7213_v15  ;;  %5437 = vmatpush3.msra.mxu0 %v7155_v38 }
 0x3af   :  { %5480 = vmatpush3.msra.mxu1 %v7215_v20  ;;  %5438 = vmatprep.subr.mxu0 %v7169_v17 }
 0x3b0   :  { %5481 = vmatprep.subr.mxu1 %v7240_v34  ;;  %5439 = vmatpush3.msra.mxu0 %v7186_v35 }
 0x3b1   :  { %5482 = vmatpush3.msra.mxu1 %v7251_v63  ;;  %5440 = vmatprep.subr.mxu0 %v7189_v2 }
 0x3b2   :  { %5483 = vmatprep.subr.mxu1 %v7253_v53  ;;  %5441 = vmatpush3.msra.mxu0 %v7195_v30 }
 0x3b3   :  { %5484 = vmatpush3.msra.mxu1 %v7262_v60  ;;  %5442 = vmatprep.subr.mxu0 %v7206_v7 }
 0x3b4   :  { %5485 = vmatprep.subr.mxu1 %v7271_v13  ;;  %5443 = vmatpush3.msra.mxu0 %v7211_v14 }
 0x3b5   :  { %5486 = vmatpush3.msra.mxu1 %v7277_v42  ;;  %5444 = vmatprep.subr.mxu0 %v7868_v43 }
 0x3b6   :  { %5487 = vmatprep.subr.mxu1 %v7869_v52  ;;  %5445 = vmatpush3.msra.mxu0 %v7870_v49 }
 0x3b7   :  { %5488 = vmatpush3.msra.mxu1 %v7871_v4  ;;  %5446 = vmatprep.subr.mxu0 %v7872_v29 }
 0x3b8   :  { %5489 = vmatprep.subr.mxu1 %v7873_v21  ;;  %5447 = vmatpush3.msra.mxu0 %v7874_v41 }
 0x3b9   :  { %5490 = vmatpush3.msra.mxu1 %v7875_v6  ;;  %5448 = vmatprep.subr.mxu0 %v7876_v3 }
 0x3ba   :  { %5491 = vmatprep.subr.mxu1 %v7877_v40  ;;  %5449 = vmatpush3.msra.mxu0 %v7878_v12 }
 0x3bb   :  { %5492 = vmatpush3.msra.mxu1 %v7879_v37  ;;  %5450 = vmatprep.subr.mxu0 %v7880_v33 }
 0x3bc   :  { %5493 = vmatprep.subr.mxu1 %v7881_v25  ;;  %5451 = vmatpush3.msra.mxu0 %v7882_v54 }
 0x3bd   :  { %5494 = vmatpush3.msra.mxu1 %v7883_v31  ;;  %5452 = vmatprep.subr.mxu0 %v7884_v16 }
 0x3be   :  { %5495 = vmatprep.subr.mxu1 %v7885_v22  ;;  %5453 = vmatpush3.msra.mxu0 %v7886_v47 }
 0x3bf   :  { %5496 = vmatpush3.msra.mxu1 %v7887_v11  ;;  %5454 = vmatprep.subr.mxu0 %v7888_v32 }
 0x3c0   :  { %5497 = vmatprep.subr.mxu1 %v7889_v44  ;;  %5455 = vmatpush3.msra.mxu0 %v7890_v5 }
 0x3c1   :  { %5498 = vmatpush3.msra.mxu1 %v7891_v28  ;;  %5456 = vmatprep.subr.mxu0 %v7892_v39 }
 0x3c2   :  { %4400 = vmatmul.mubr.f32.vlgmr.msra.gmra.mxu1 %v3919_v56  ;;  %5537 = vmatprep.subr.mxu1 %v7893_v45  ;;  %v7898_v56 = vld [vmem:[#allocation42_spill] sm:$0xff]  ;;  %v7899_v45 = vld [vmem:[#allocation44_spill] sm:$0xff] }
 0x3c3   :  { %5457 = vmatpush3.msra.mxu0 %v7894_v57  ;;  %5538 = vmatpush3.msra.mxu1 %v7114_v61  ;;  %v7900_v61 = vld [vmem:[#allocation46_spill] sm:$0xff] }
 0x3c4   :  { %4670 = vmatprep.mubr.f32.mxu1 %v7439_v9  ;;  %5458 = vmatprep.subr.mxu0 %v7895_v0 }
 0x3c5   :  { %5539 = vmatprep.subr.mxu1 %v7119_v18  ;;  %5459 = vmatpush3.msra.mxu0 %v7896_v8  ;;  %v7901_v18 = vld [vmem:[#allocation14_spill] sm:$0xff] }
 0x3c6   :  { %5540 = vmatpush3.msra.mxu1 %v7125_v36  ;;  %5460 = vmatprep.subr.mxu0 %v7897_v46  ;;  %v7902_v36 = vand.u32 4294901760, %v7901_v18 }
 0x3c7   :  { %5541 = vmatprep.subr.mxu1 %v7132_v59  ;;  %5461 = vmatpush3.msra.mxu0 %v7898_v56  ;;  %v7903_v59 = vand.u32 4294901760, %v7123_v23  ;;  %v7907_v23 = vand.u32 4294901760, %v7155_v38 }
 0x3c8   :  { %5542 = vmatpush3.msra.mxu1 %v7139_v27  ;;  %5462 = vmatprep.subr.mxu0 %v7899_v45  ;;  %v7904_v27 = vand.u32 4294901760, %v7130_v58  ;;  %v7908_v58 = vand.u32 4294901760, %v7169_v17  ;;  %v7911_v17 = vand.u32 4294901760, %v7195_v30  ;;  %v7914_v30 = vand.u32 4294901760, %v7868_v43 }
 0x3c9   :  { %5543 = vmatprep.subr.mxu1 %v7161_v10  ;;  %5463 = vmatpush3.msra.mxu0 %v7900_v61  ;;  %v7905_v10 = vand.u32 4294901760, %v7137_v24  ;;  %v7909_v24 = vand.u32 4294901760, %v7186_v35 }
 0x3ca   :  { %5544 = vmatpush3.msra.mxu1 %v7171_v26  ;;  %4292 = vmatmul.mubr.f32.vlgmr.msra.gmra.mxu0 %v7437_v48  ;;  %v3780_v26 = vld [vmem:[#allocation6 + $0x18] sm:$0xff]  ;;  %v7918_v48 = vand.u32 4294901760, %v7876_v3 }
 0x3cb   :  { %5502 = vmatprep.subr.mxu0 %v7902_v36  ;;  %5545 = vmatprep.subr.mxu1 %v7173_v1  ;;  %v7906_v1 = vand.u32 4294901760, %v7152_v50  ;;  %v3778_v50 = vld [vmem:[#allocation6 + $0x8] sm:$0xff] }
 0x3cc   :  { %5503 = vmatpush3.msra.mxu0 %v7903_v59  ;;  %4566 = vmatprep.mubr.f32.mxu0 %v7439_v9 }
 0x3cd   :  { %5546 = vmatpush3.msra.mxu1 %v7182_v51  ;;  %5504 = vmatprep.subr.mxu0 %v7904_v27  ;;  %v3779_v51 = vld [vmem:[#allocation6 + $0x10] sm:$0xff] }
 0x3ce   :  { %5547 = vmatprep.subr.mxu1 %v7191_v19  ;;  %5505 = vmatpush3.msra.mxu0 %v7905_v10  ;;  %v7543_v19 = vand.u32 4294901760, %v3780_v26  ;;  %v7551_v38 = vand.u32 4294901760, %v3779_v51 }
 0x3cf   :  { %5548 = vmatpush3.msra.mxu1 %v7197_v62  ;;  %5506 = vmatprep.subr.mxu0 %v7906_v1  ;;  %v7910_v62 = vand.u32 4294901760, %v7189_v2  ;;  %v7913_v2 = vand.u32 4294901760, %v7211_v14  ;;  %v7916_v14 = vand.u32 4294901760, %v7872_v29 }
 0x3d0   :  { %5549 = vmatprep.subr.mxu1 %v7213_v15  ;;  %5507 = vmatpush3.msra.mxu0 %v7907_v23  ;;  %v3777_v15 = vld [vmem:[#allocation6] sm:$0xff]  ;;  %v7560_v35 = vsub.f32 %v3780_v26, %v7543_v19 }
 0x3d1   :  { %5550 = vmatpush3.msra.mxu1 %v7215_v20  ;;  %5508 = vmatprep.subr.mxu0 %v7908_v58  ;;  %v7912_v20 = vand.u32 4294901760, %v7206_v7  ;;  %v7573_v7 = vand.u32 4294901760, %v3777_v15 }
 0x3d2   :  { %5551 = vmatprep.subr.mxu1 %v7240_v34  ;;  %5509 = vmatpush3.msra.mxu0 %v7909_v24  ;;  %v7562_v34 = vand.u32 4294901760, %v3778_v50 }
 0x3d3   :  { %5552 = vmatpush3.msra.mxu1 %v7251_v63  ;;  %5510 = vmatprep.subr.mxu0 %v7910_v62  ;;  %v7571_v63 = vsub.f32 %v3779_v51, %v7551_v38  ;;  %v7593_v43 = vsub.f32 %v3777_v15, %v7573_v7 }
 0x3d4   :  { %5553 = vmatprep.subr.mxu1 %v7253_v53  ;;  %5511 = vmatpush3.msra.mxu0 %v7911_v17  ;;  %v7915_v53 = vand.u32 4294901760, %v7870_v49  ;;  %v7920_v49 = vand.u32 4294901760, %v7880_v33 }
 0x3d5   :  { %5554 = vmatpush3.msra.mxu1 %v7262_v60  ;;  %5512 = vmatprep.subr.mxu0 %v7912_v20  ;;  %v4783_v60 = vand.u32 4294901760, %v7560_v35  ;;  %v4790_v9 = vand.u32 4294901760, %v7571_v63  ;;  %v4804_v3 = vand.u32 4294901760, %v7593_v43 }
 0x3d6   :  { %5555 = vmatprep.subr.mxu1 %v7271_v13  ;;  %5513 = vmatpush3.msra.mxu0 %v7913_v2  ;;  %v7583_v13 = vsub.f32 %v3778_v50, %v7562_v34 }
 0x3d7   :  { %5556 = vmatpush3.msra.mxu1 %v7277_v42  ;;  %5514 = vmatprep.subr.mxu0 %v7914_v30  ;;  %v7917_v42 = vand.u32 4294901760, %v7874_v41  ;;  %v7922_v41 = vand.u32 4294901760, %v7884_v16  ;;  %v4805_v16 = vsub.f32 %v7593_v43, %v4804_v3 }
 0x3d8   :  { %5557 = vmatprep.subr.mxu1 %v7869_v52  ;;  %5515 = vmatpush3.msra.mxu0 %v7915_v53  ;;  %v7919_v52 = vand.u32 4294901760, %v7878_v12  ;;  %v4797_v29 = vand.u32 4294901760, %v7583_v13  ;;  %v7924_v12 = vand.u32 4294901760, %v7888_v32  ;;  %v7929_v32 = vand.u32 4294901760, %v7895_v0 }
 0x3d9   :  { %5558 = vmatpush3.msra.mxu1 %v7871_v4  ;;  %5516 = vmatprep.subr.mxu0 %v7916_v14  ;;  %v4784_v4 = vsub.f32 %v7560_v35, %v4783_v60  ;;  %v7934_v0 = vand.u32 4294901760, %v7900_v61 }
 0x3da   :  { %5559 = vmatprep.subr.mxu1 %v7873_v21  ;;  %5517 = vmatpush3.msra.mxu0 %v7917_v42  ;;  %v7921_v21 = vand.u32 4294901760, %v7882_v54  ;;  %v4798_v33 = vsub.f32 %v7583_v13, %v4797_v29  ;;  %v7926_v54 = vand.u32 4294901760, %v7892_v39  ;;  %v7932_v39 = vand.u32 4294901760, %v7898_v56  ;;  %v7938_v56 = vld [vmem:[#allocation10_spill] sm:$0xff] }
 0x3db   :  { %5560 = vmatpush3.msra.mxu1 %v7875_v6  ;;  %5518 = vmatprep.subr.mxu0 %v7918_v48  ;;  %v4791_v6 = vsub.f32 %v7571_v63, %v4790_v9 }
 0x3dc   :  { %5561 = vmatprep.subr.mxu1 %v7877_v40  ;;  %5519 = vmatpush3.msra.mxu0 %v7919_v52  ;;  %v7923_v40 = vand.u32 4294901760, %v7886_v47  ;;  %v7928_v47 = vand.u32 4294901760, %v7894_v57  ;;  %v7933_v57 = vand.u32 4294901760, %v7899_v45 }
 0x3dd   :  { %5562 = vmatpush3.msra.mxu1 %v7879_v37  ;;  %5520 = vmatprep.subr.mxu0 %v7920_v49  ;;  %v4785_v37 = vand.u32 4294901760, %v4784_v4 }
 0x3de   :  { %5563 = vmatprep.subr.mxu1 %v7881_v25  ;;  %5521 = vmatpush3.msra.mxu0 %v7921_v21  ;;  %v7925_v25 = vand.u32 4294901760, %v7890_v5  ;;  %v4806_v5 = vand.u32 4294901760, %v4805_v16 }
 0x3df   :  { %5564 = vmatpush3.msra.mxu1 %v7883_v31  ;;  %5522 = vmatprep.subr.mxu0 %v7922_v41  ;;  %v4792_v31 = vand.u32 4294901760, %v4791_v6 }
 0x3e0   :  { %5565 = vmatprep.subr.mxu1 %v7885_v22  ;;  %5523 = vmatpush3.msra.mxu0 %v7923_v40  ;;  %v7927_v22 = vmov 0.0  }
 0x3e1   :  { %5566 = vmatpush3.msra.mxu1 %v7887_v11  ;;  %5524 = vmatprep.subr.mxu0 %v7924_v12  ;;  %v4799_v11 = vand.u32 4294901760, %v4798_v33 }
 0x3e2   :  { %5567 = vmatprep.subr.mxu1 %v7889_v44  ;;  %5525 = vmatpush3.msra.mxu0 %v7925_v25  ;;  %v7930_v44 = vand.u32 4294901760, %v7896_v8  ;;  %v7935_v8 = vld [vmem:[#allocation9_spill] sm:$0xff] }
 0x3e3   :  { %5568 = vmatpush3.msra.mxu1 %v7891_v28  ;;  %5526 = vmatprep.subr.mxu0 %v7926_v54  ;;  %v7931_v28 = vand.u32 4294901760, %v7897_v46  ;;  %v7937_v46 = vld [vmem:[#allocation11_spill] sm:$0xff] }
 0x3e4   :  { %4672 = vmatmul.mubr.f32.vlgmr.msra.gmra.mxu1 %v7434_v55  ;;  %6015 = vmatprep.subr.mxu1 %v7927_v22 }
 0x3e5   :  { %5527 = vmatpush3.msra.mxu0 %v7928_v47  ;;  %6016 = vmatpush3.msra.mxu1 %v4785_v37 }
 0x3e6   :  { %5528 = vmatprep.subr.mxu0 %v7929_v32  ;;  %6017 = vmatprep.subr.mxu1 %v7927_v22 }
 0x3e7   :  { %5529 = vmatpush3.msra.mxu0 %v7930_v44  ;;  %6018 = vmatpush3.msra.mxu1 %v4792_v31 }
 0x3e8   :  { %5530 = vmatprep.subr.mxu0 %v7931_v28  ;;  %6019 = vmatprep.subr.mxu1 %v7927_v22 }
 0x3e9   :  { %5531 = vmatpush3.msra.mxu0 %v7932_v39  ;;  %6020 = vmatpush3.msra.mxu1 %v4799_v11 }
 0x3ea   :  { %5532 = vmatprep.subr.mxu0 %v7933_v57  ;;  %6021 = vmatprep.subr.mxu1 %v7927_v22 }
 0x3eb   :  { %5533 = vmatpush3.msra.mxu0 %v7934_v0  ;;  %6022 = vmatpush3.msra.mxu1 %v4806_v5 }
 0x3ec   :  { %6023 = vmatprep.mubr.msk.f32.mxu1 %vm6165_vm0, %v7927_v22  ;;  %4568 = vmatmul.mubr.f32.vlgmr.msra.gmra.mxu0 %v7434_v55  ;;  %v7936_v55 = vld [vmem:[#allocation12_spill] sm:$0xff] }
 0x3ed   :  { %6004 = vmatprep.subr.mxu0 %v7927_v22  ;;  %6024 = vmatmul.mubr.f32.vlgmr.msra.gmra.mxu1 %v7935_v8 }
 0x3ee   :  { %6037 = vmatprep.subr.mxu1 %v7927_v22  ;;  %6005 = vmatpush3.msra.mxu0 %v7543_v19 }
 0x3ef   :  { %6038 = vmatpush3.msra.mxu1 %v7543_v19  ;;  %6006 = vmatprep.subr.mxu0 %v7927_v22 }
 0x3f0   :  { %6039 = vmatprep.subr.mxu1 %v7927_v22  ;;  %6007 = vmatpush3.msra.mxu0 %v7551_v38 }
 0x3f1   :  { %6040 = vmatpush3.msra.mxu1 %v7551_v38  ;;  %6008 = vmatprep.subr.mxu0 %v7927_v22 }
 0x3f2   :  { %6041 = vmatprep.subr.mxu1 %v7927_v22  ;;  %6009 = vmatpush3.msra.mxu0 %v7562_v34 }
 0x3f3   :  { %6042 = vmatpush3.msra.mxu1 %v7562_v34  ;;  %6010 = vmatprep.subr.mxu0 %v7927_v22 }
 0x3f4   :  { %6043 = vmatprep.subr.mxu1 %v7927_v22  ;;  %6011 = vmatpush3.msra.mxu0 %v7573_v7 }
 0x3f5   :  { %6012 = vmatprep.mubr.msk.f32.mxu0 %vm6165_vm0, %v7927_v22  ;;  %6044 = vmatpush3.msra.mxu1 %v7573_v7 }
 0x3f6   :  { %6045 = vmatprep.mubr.msk.f32.mxu1 %vm6165_vm0, %v7927_v22  ;;  %6013 = vmatmul.mubr.f32.vlgmr.msra.gmra.mxu0 %v7936_v55 }
 0x3f7   :  { %6026 = vmatprep.subr.mxu0 %v7927_v22  ;;  %6046 = vmatmul.mubr.f32.vlgmr.msra.gmra.mxu1 %v7937_v46 }
 0x3f8   :  { %6059 = vmatprep.subr.mxu1 %v7927_v22  ;;  %6027 = vmatpush3.msra.mxu0 %v7560_v35 }
 0x3f9   :  { %6060 = vmatpush3.msra.mxu1 %v7543_v19  ;;  %6028 = vmatprep.subr.mxu0 %v7927_v22 }
 0x3fa   :  { %6061 = vmatprep.subr.mxu1 %v7927_v22  ;;  %6029 = vmatpush3.msra.mxu0 %v7571_v63 }
 0x3fb   :  { %6062 = vmatpush3.msra.mxu1 %v7551_v38  ;;  %6030 = vmatprep.subr.mxu0 %v7927_v22 }
 0x3fc   :  { %6063 = vmatprep.subr.mxu1 %v7927_v22  ;;  %6031 = vmatpush3.msra.mxu0 %v7583_v13 }
 0x3fd   :  { %6064 = vmatpush3.msra.mxu1 %v7562_v34  ;;  %6032 = vmatprep.subr.mxu0 %v7927_v22 }
 0x3fe   :  { %6065 = vmatprep.subr.mxu1 %v7927_v22  ;;  %6033 = vmatpush3.msra.mxu0 %v7593_v43 }
 0x3ff   :  { %6034 = vmatprep.mubr.msk.f32.mxu0 %vm6165_vm0, %v7927_v22  ;;  %6066 = vmatpush3.msra.mxu1 %v7573_v7 }
 0x400   :  { %6067 = vmatprep.mubr.msk.f32.mxu1 %vm6165_vm0, %v7927_v22  ;;  %6035 = vmatmul.mubr.f32.vlgmr.msra.gmra.mxu0 %v7938_v56 }
 0x401   :  { %6048 = vmatprep.subr.mxu0 %v7927_v22  ;;  %6068 = vmatmul.mubr.f32.vlgmr.msra.gmra.mxu1 %v7935_v8 }
 0x402   :  { %6049 = vmatpush3.msra.mxu0 %v4783_v60  ;;  %6056 = vmatprep.mubr.msk.f32.mxu0 %vm6165_vm0, %v7927_v22 }
 0x403   :  { %6050 = vmatprep.subr.mxu0 %v7927_v22 }
 0x404   :  { %6051 = vmatpush3.msra.mxu0 %v4790_v9 }
 0x405   :  { %6052 = vmatprep.subr.mxu0 %v7927_v22 }
 0x406   :  { %6053 = vmatpush3.msra.mxu0 %v4797_v29 }
 0x407   :  { %6054 = vmatprep.subr.mxu0 %v7927_v22 }
 0x408   :  { %6055 = vmatpush3.msra.mxu0 %v4804_v3 }
 0x409   :  { %6057 = vmatmul.mubr.f32.vlgmr.msra.gmra.mxu0 %v7935_v8 }
 0x461   :  { %v5429_v45 = vpop.f32.mrf.mxu1 }
 0x463   :  { %v5430_v61 = vpop.f32.mrf.mxu1 }
 0x464   :  { %v5431_v58 = vadd.f32 %v5430_v61, %v5429_v45 }
 0x469   :  { %v5394_v18 = vpop.f32.mrf.mxu0 }
 0x46b   :  { %v5395_v59 = vpop.f32.mrf.mxu0 }
 0x46c   :  { %v5396_v23 = vadd.f32 %v5395_v59, %v5394_v18 }
 0x46e   :  { %v4156_v62 = vadd.f32 %v5431_v58, %v5396_v23 }
 0x482   :  { %v5499_v36 = vpop.f32.mrf.mxu1 }
 0x484   :  { %v5500_v27 = vpop.f32.mrf.mxu1 }
 0x485   :  { %v5501_v20 = vadd.f32 %v5500_v27, %v5499_v36 }
 0x48a   :  { %v5464_v10 = vpop.f32.mrf.mxu0 }
 0x48c   :  { %v5465_v1 = vpop.f32.mrf.mxu0 }
 0x48d   :  { %v5466_v19 = vadd.f32 %v5465_v1, %v5464_v10 }
 0x48f   :  { %v4294_v15 = vadd.f32 %v5466_v19, %v4156_v62 }
 0x491   :  { %v4402_v34 = vadd.f32 %v5501_v20, %v4294_v15 }
 0x4a4   :  { %v5569_v26 = vpop.f32.mrf.mxu1 }
 0x4a6   :  { %v5570_v51 = vpop.f32.mrf.mxu1 }
 0x4a7   :  { %v5571_v7 = vadd.f32 %v5570_v51, %v5569_v26 }
 0x4ac   :  { %v5534_v24 = vpop.f32.mrf.mxu0 }
 0x4ad   :  { %v4843_v50 = vpop.f32.mrf.mxu1 }
 0x4ae   :  { %v5535_v38 = vpop.f32.mrf.mxu0 }
 0x4af   :  { %v6025_v17 = vpop.f32.mrf.mxu1  ;;  %v5536_v35 = vadd.f32 %v5535_v38, %v5534_v24 }
 0x4b1   :  { %v4570_v2 = vadd.f32 %v5536_v35, %v4402_v34 }
 0x4b3   :  { %v4674_v60 = vadd.f32 %v5571_v7, %v4570_v2 }
 0x4b6   :  { %v4752_v30 = vpop.f32.mrf.mxu0 }
 0x4b7   :  { %v5000_v63 = vpop.f32.mrf.mxu1  ;;  %v4753_v13 = vadd.f32 %v4752_v30, %v4674_v60 }
 0x4b8   :  { %v6014_v53 = vpop.f32.mrf.mxu0 }
 0x4b9   :  { %v6047_v14 = vpop.f32.mrf.mxu1  ;;  %v4844_v9 = vadd.f32 %v4843_v50, %v4753_v13 }
 0x4c0   :  { %v4923_v42 = vpop.f32.mrf.mxu0 }
 0x4c1   :  { %v5158_v48 = vpop.f32.mrf.mxu1  ;;  %v4924_v49 = vadd.f32 %v4923_v42, %v4844_v9 }
 0x4c2   :  { %v6036_v43 = vpop.f32.mrf.mxu0 }
 0x4c3   :  { %v6069_v52 = vpop.f32.mrf.mxu1  ;;  %v5001_v4 = vadd.f32 %v5000_v63, %v4924_v49 }
 0x4c9   :  { %v5083_v29 = vpop.f32.mrf.mxu0 }
 0x4ca   :  { %v5084_v21 = vadd.f32 %v5083_v29, %v5001_v4 }
 0x4cb   :  { %v6058_v41 = vpop.f32.mrf.mxu0 }
 0x4cc   :  { %v5159_v6 = vadd.f32 %v5158_v48, %v5084_v21 }
 0x4ce   :  { %5162 = vst [vmem:[%s7724_s6] sm:$0xff] %v5159_v6 }
 0x4cf   :  { %5167 = vsyncpa [#allocation3], 1 }
 0x4d0   :  { %5168 = vsyncpa [#allocation5], 1 }

</bundles_post_ra>
